<compile_context>
chip_gen: v7x
topology: tpu7x:2x2x1
jax: 0.10.0
libtpu: 0.0.40
codegen_flags: <defaults>
</compile_context>

<pallas_src>
import jax
import jax.numpy as jnp
from jax.experimental import pallas as pl
from jax.experimental.pallas import tpu as pltpu


def _add_conv1x1_kernel(a_ref, b_ref, w_ref, o_ref):
    # a_ref, b_ref: [Cin, HW]   w_ref: [cout_tile, Cin]   o_ref: [cout_tile, HW]
    x = a_ref[...] + b_ref[...]                       # fused residual add (VPU)
    o_ref[...] = jnp.dot(w_ref[...], x,               # W @ X on the MXU
                         preferred_element_type=jnp.float32)


def _default_cout_tiles():
    """1 grid step on v5e/v6e (single TC); 2 on v7x so each TC takes one step."""
    try:
        kind = jax.devices()[0].device_kind.lower()
        if "v7" in kind:
            return 2
    except Exception:
        pass
    return 1


def add_conv1x1(x263, x249, weight, *, n_cout_tiles=None):
    """x263, x249: [N, Cin, H, W] (NCHW). weight: [Cout, Cin, 1, 1].
    Returns [N, Cout, H, W] (NCHW), matching PyTorch Conv2d(..., bias=False)."""
    N, Cin, H, W = x263.shape
    Cout = weight.shape[0]
    HW = H * W

    if n_cout_tiles is None:
        n_cout_tiles = _default_cout_tiles()
    # Tile must divide Cout and keep the sublane axis a multiple of 8.
    if Cout % n_cout_tiles != 0 or (Cout // n_cout_tiles) % 8 != 0:
        n_cout_tiles = 1
    cout_tile = Cout // n_cout_tiles

    # Metadata-only reshapes (NCHW is contiguous in H,W): no transposes, no copies.
    a = x263.reshape(N, Cin, HW)
    b = x249.reshape(N, Cin, HW)
    w = weight.reshape(Cout, Cin)

    cost = pl.CostEstimate(
        flops=2 * N * Cout * Cin * HW,
        transcendentals=0,
        bytes_accessed=(a.size + b.size + w.size + N * Cout * HW) * 4,
    )

    out = pl.pallas_call(
        _add_conv1x1_kernel,
        out_shape=jax.ShapeDtypeStruct((N, Cout, HW), jnp.float32),
        grid=(N, n_cout_tiles),
        in_specs=[
            # X blocks: batch dim squeezed; same block across the Cout axis -> resident.
            pl.BlockSpec((None, Cin, HW), lambda n, j: (n, 0, 0)),
            pl.BlockSpec((None, Cin, HW), lambda n, j: (n, 0, 0)),
            # Weight tile: [cout_tile, Cin]; constant across batch so never re-fetched per n.
            pl.BlockSpec((cout_tile, Cin), lambda n, j: (j, 0)),
        ],
        out_specs=pl.BlockSpec((None, cout_tile, HW), lambda n, j: (n, j, 0)),
        compiler_params=pltpu.CompilerParams(
            dimension_semantics=("parallel", "parallel")),
        cost_estimate=cost,
    )(a, b, w)

    # [N, Cout, H*W] -> NCHW, metadata-only.
    return out.reshape(N, Cout, H, W)


if __name__ == "__main__":
    key = jax.random.PRNGKey(0)
    k1, k2, k3 = jax.random.split(key, 3)

    # Shapes implied by the module's forward pass.
    N, Cin, H, W = 1, 160, 14, 14
    Cout = 960

    x263 = jax.random.normal(k1, (N, Cin, H, W), dtype=jnp.float32)
    x249 = jax.random.normal(k2, (N, Cin, H, W), dtype=jnp.float32)
    # Deterministic synthetic conv weight (Conv2d(160, 960, 1, bias=False)).
    weight = jax.random.normal(k3, (Cout, Cin, 1, 1), dtype=jnp.float32) * 0.05

    out = add_conv1x1(x263, x249, weight)
    out = jax.block_until_ready(out)

    # Pure-JAX reference check (1x1 conv == einsum over channels).
    ref = jnp.einsum("nchw,oc->nohw", x263 + x249, weight.reshape(Cout, Cin))
    assert out.shape == (N, Cout, H, W), out.shape
    assert jnp.allclose(out, ref, atol=1e-3, rtol=1e-3)

    print("KERNEL_OK")
</pallas_src>

<mosaic_0001>
module attributes {stable_mosaic.version = 11 : i64} {
  func.func @_add_conv1x1_kernel(%arg0: i32, %arg1: i32, %arg2: memref<1x160x196xf32, #tpu.memory_space<vmem>>, %arg3: memref<1x160x196xf32, #tpu.memory_space<vmem>>, %arg4: memref<960x160xf32, #tpu.memory_space<vmem>>, %arg5: memref<1x960x196xf32, #tpu.memory_space<vmem>>) attributes {dimension_semantics = [#tpu.dimension_semantics<parallel>, #tpu.dimension_semantics<parallel>], iteration_bounds = array<i64: 1, 1>, scalar_prefetch = 0 : i64, scratch_operands = 0 : i64, tpu.core_type = #tpu.core_type<tc>, window_params = [{transform_indices = @transform_0, window_bounds = array<i64: 1, 160, 196>}, {transform_indices = @transform_1, window_bounds = array<i64: 1, 160, 196>}, {transform_indices = @transform_2, window_bounds = array<i64: 960, 160>}, {transform_indices = @transform_3, window_bounds = array<i64: 1, 960, 196>}]} {
    %c0 = arith.constant 0 : index
    %c0_0 = arith.constant 0 : index
    %c0_1 = arith.constant 0 : index
    %0 = vector.load %arg2[%c0, %c0_0, %c0_1] : memref<1x160x196xf32, #tpu.memory_space<vmem>>, vector<1x160x196xf32>
    %1 = vector.shape_cast %0 : vector<1x160x196xf32> to vector<160x196xf32>
    %c0_2 = arith.constant 0 : index
    %c0_3 = arith.constant 0 : index
    %c0_4 = arith.constant 0 : index
    %2 = vector.load %arg3[%c0_2, %c0_3, %c0_4] : memref<1x160x196xf32, #tpu.memory_space<vmem>>, vector<1x160x196xf32>
    %3 = vector.shape_cast %2 : vector<1x160x196xf32> to vector<160x196xf32>
    %4 = arith.addf %1, %3 : vector<160x196xf32>
    %c0_5 = arith.constant 0 : index
    %c0_6 = arith.constant 0 : index
    %5 = vector.load %arg4[%c0_5, %c0_6] : memref<960x160xf32, #tpu.memory_space<vmem>>, vector<960x160xf32>
    %cst = arith.constant dense<0.000000e+00> : vector<960x196xf32>
    %6 = tpu.matmul %5, %4, %cst {dimension_numbers = #tpu.dot_dimension_numbers<[1], [0], [0], [1], [0, 0, 1, 1], [], []>} : vector<960x160xf32>, vector<160x196xf32>, vector<960x196xf32> -> vector<960x196xf32>
    %c0_7 = arith.constant 0 : index
    %c0_8 = arith.constant 0 : index
    %c0_9 = arith.constant 0 : index
    %7 = vector.load %arg5[%c0_7, %c0_8, %c0_9] : memref<1x960x196xf32, #tpu.memory_space<vmem>>, vector<1x960x196xf32>
    %8 = vector.shape_cast %7 : vector<1x960x196xf32> to vector<960x196xf32>
    %9 = vector.shape_cast %6 : vector<960x196xf32> to vector<1x960x196xf32>
    tpu.vector_store %arg5[%c0_7, %c0_8, %c0_9], %9 {strides = array<i32>} : memref<1x960x196xf32, #tpu.memory_space<vmem>>, vector<1x960x196xf32>,
    return
  }
  func.func @transform_0(%arg0: i32, %arg1: i32) -> (i32, i32, i32) {
    %c0_i32 = arith.constant 0 : i32
    %c0_i32_0 = arith.constant 0 : i32
    %c0_i32_1 = arith.constant 0 : i32
    return %arg0, %c0_i32, %c0_i32_0 : i32, i32, i32
  }
  func.func @transform_1(%arg0: i32, %arg1: i32) -> (i32, i32, i32) {
    %c0_i32 = arith.constant 0 : i32
    %c0_i32_0 = arith.constant 0 : i32
    %c0_i32_1 = arith.constant 0 : i32
    return %arg0, %c0_i32, %c0_i32_0 : i32, i32, i32
  }
  func.func @transform_2(%arg0: i32, %arg1: i32) -> (i32, i32) {
    %c0_i32 = arith.constant 0 : i32
    %c0_i32_0 = arith.constant 0 : i32
    return %arg1, %c0_i32 : i32, i32
  }
  func.func @transform_3(%arg0: i32, %arg1: i32) -> (i32, i32, i32) {
    %c0_i32 = arith.constant 0 : i32
    %c0_i32_0 = arith.constant 0 : i32
    return %arg0, %arg1, %c0_i32 : i32, i32, i32
  }
}

</mosaic_0001>

<bundles_post_ra>
// kernel: tpu_custom_call.1
= control target key start
LH: loop header
LB: loop body
LE: loop exit
PB: predicated region body
PF: predicated region fallthrough
CT: control target
= control target key end

     0   :  { %vm374_vm0 = vcmask 261120   ;;  %vm1521_vm1 = vcmask 556032   ;;  %s3885_s0 = inlined_call_operand.vmem [shape: f32[1,160,196], index: 0, kind: input, shape index: {}]   ;;  %s3886_s1 = inlined_call_operand.vmem [shape: f32[1,160,196], index: 1, kind: input, shape index: {}]   ;;  %s3887_s2 = inlined_call_operand.vmem [shape: f32[960,160], index: 2, kind: input, shape index: {}]   ;;  %s3888_s3 = inlined_call_operand.vmem [shape: f32[1,960,196], index: 3, kind: output, shape index: {}]  }
   0x1   :  { %v15_v0 = vld [vmem:[%s3885_s0 + $0x8] sm:$0xff]  ;;  %v17_v1 = vld [vmem:[%s3885_s0 + $0x18] sm:$0xff]  ;;  %v14_v5 = vld [vmem:[%s3885_s0] sm:$0xff] }
   0x2   :  { %v55_v2 = vld [vmem:[%s3886_s1 + $0x8] sm:$0xff]  ;;  %v57_v3 = vld [vmem:[%s3886_s1 + $0x18] sm:$0xff]  ;;  %v16_v6 = vld [vmem:[%s3885_s0 + $0x10] sm:$0xff] }
   0x3   :  { %v95_v4 = vadd.f32 %v55_v2, %v15_v0  ;;  %v97_v7 = vadd.f32 %v57_v3, %v17_v1  ;;  %v54_v8 = vld [vmem:[%s3886_s1] sm:$0xff]  ;;  %v56_v9 = vld [vmem:[%s3886_s1 + $0x10] sm:$0xff]  ;;  %v19_v10 = vld [vmem:[%s3885_s0 + $0x28] sm:$0xff] }
   0x4   :  { %v94_v11 = vadd.f32 %v54_v8, %v14_v5  ;;  %v96_v12 = vadd.f32 %v56_v9, %v16_v6  ;;  %v21_v13 = vld [vmem:[%s3885_s0 + $0x38] sm:$0xff]  ;;  %v59_v14 = vld [vmem:[%s3886_s1 + $0x28] sm:$0xff]  ;;  %v18_v19 = vld [vmem:[%s3885_s0 + $0x20] sm:$0xff] }
   0x5   :  { %v61_v15 = vld [vmem:[%s3886_s1 + $0x38] sm:$0xff]  ;;  %v1885_v16 = vpack.c.bf16 %v97_v7, %v95_v4  ;;  %v99_v17 = vadd.f32 %v59_v14, %v19_v10  ;;  %v20_v20 = vld [vmem:[%s3885_s0 + $0x30] sm:$0xff]  ;;  %v58_v21 = vld [vmem:[%s3886_s1 + $0x20] sm:$0xff] }
   0x6   :  { %v101_v18 = vadd.f32 %v61_v15, %v21_v13  ;;  %v1887_v22 = vpack.c.bf16 %v96_v12, %v94_v11  ;;  %v60_v23 = vld [vmem:[%s3886_s1 + $0x30] sm:$0xff]  ;;  %v98_v24 = vadd.f32 %v58_v21, %v18_v19  ;;  %v23_v25 = vld [vmem:[%s3885_s0 + $0x48] sm:$0xff]  ;;  %v25_v26 = vld [vmem:[%s3885_s0 + $0x58] sm:$0xff] }
   0x7   :  { %1886 = vmatprep.subr.bf16.mxu0 %v1885_v16  ;;  %1925 = vmatprep.subr.bf16.mxu1 %v1885_v16  ;;  %v100_v28 = vadd.f32 %v60_v23, %v20_v20  ;;  %v63_v29 = vld [vmem:[%s3886_s1 + $0x48] sm:$0xff]  ;;  %v65_v30 = vld [vmem:[%s3886_s1 + $0x58] sm:$0xff]  ;;  %v22_v31 = vld [vmem:[%s3885_s0 + $0x40] sm:$0xff] }
   0x8   :  { %v1889_v27 = vpack.c.bf16 %v101_v18, %v99_v17  ;;  %1888 = vmatpush1.bf16.msra.mxu0 %v1887_v22  ;;  %1935 = vmatpush1.bf16.msra.mxu1 %v1887_v22  ;;  %v103_v32 = vadd.f32 %v63_v29, %v23_v25  ;;  %v105_v33 = vadd.f32 %v65_v30, %v25_v26  ;;  %v24_v34 = vld [vmem:[%s3885_s0 + $0x50] sm:$0xff]  ;;  %v62_v35 = vld [vmem:[%s3886_s1 + $0x40] sm:$0xff]  ;;  %v27_v40 = vld [vmem:[%s3885_s0 + $0x68] sm:$0xff] }
   0x9   :  { %v64_v36 = vld [vmem:[%s3886_s1 + $0x50] sm:$0xff]  ;;  %v1891_v37 = vpack.c.bf16 %v100_v28, %v98_v24  ;;  %v102_v38 = vadd.f32 %v62_v35, %v22_v31  ;;  %v29_v41 = vld [vmem:[%s3885_s0 + $0x78] sm:$0xff]  ;;  %v67_v42 = vld [vmem:[%s3886_s1 + $0x68] sm:$0xff] }
   0xa   :  { %1890 = vmatprep.subr.bf16.mxu0 %v1889_v27  ;;  %1926 = vmatprep.subr.bf16.mxu1 %v1889_v27  ;;  %v104_v39 = vadd.f32 %v64_v36, %v24_v34  ;;  %v1893_v43 = vpack.c.bf16 %v105_v33, %v103_v32  ;;  %v69_v44 = vld [vmem:[%s3886_s1 + $0x78] sm:$0xff]  ;;  %v107_v45 = vadd.f32 %v67_v42, %v27_v40  ;;  %v26_v46 = vld [vmem:[%s3885_s0 + $0x60] sm:$0xff]  ;;  %v28_v47 = vld [vmem:[%s3885_s0 + $0x70] sm:$0xff] }
   0xb   :  { %v109_v48 = vadd.f32 %v69_v44, %v29_v41  ;;  %v66_v49 = vld [vmem:[%s3886_s1 + $0x60] sm:$0xff]  ;;  %v68_v50 = vld [vmem:[%s3886_s1 + $0x70] sm:$0xff]  ;;  %v31_v51 = vld [vmem:[%s3885_s0 + $0x88] sm:$0xff] }
   0xc   :  { %1892 = vmatpush1.bf16.msra.mxu0 %v1891_v37  ;;  %1936 = vmatpush1.bf16.msra.mxu1 %v1891_v37  ;;  %v1895_v52 = vpack.c.bf16 %v104_v39, %v102_v38  ;;  %v106_v53 = vadd.f32 %v66_v49, %v26_v46  ;;  %v108_v54 = vadd.f32 %v68_v50, %v28_v47  ;;  %v33_v55 = vld [vmem:[%s3885_s0 + $0x98] sm:$0xff]  ;;  %v71_v56 = vld [vmem:[%s3886_s1 + $0x88] sm:$0xff]  ;;  %v30_v61 = vld [vmem:[%s3885_s0 + $0x80] sm:$0xff] }
   0xd   :  { %v73_v57 = vld [vmem:[%s3886_s1 + $0x98] sm:$0xff]  ;;  %1894 = vmatprep.subr.bf16.mxu0 %v1893_v43  ;;  %1927 = vmatprep.subr.bf16.mxu1 %v1893_v43  ;;  %v1897_v58 = vpack.c.bf16 %v109_v48, %v107_v45  ;;  %v111_v59 = vadd.f32 %v71_v56, %v31_v51  ;;  %v32_v62 = vld [vmem:[%s3885_s0 + $0x90] sm:$0xff]  ;;  %v70_v63 = vld [vmem:[%s3886_s1 + $0x80] sm:$0xff] }
   0xe   :  { %v113_v60 = vadd.f32 %v73_v57, %v33_v55  ;;  %v72_v0 = vld [vmem:[%s3886_s1 + $0x90] sm:$0xff]  ;;  %v35_v1 = vld [vmem:[%s3885_s0 + $0xa8] sm:$0xff]  ;;  %v37_v2 = vld [vmem:[%s3885_s0 + $0xb8] sm:$0xff]  ;;  %v1899_v5 = vpack.c.bf16 %v108_v54, %v106_v53  ;;  %v110_v6 = vadd.f32 %v70_v63, %v30_v61 }
   0xf   :  { %v75_v3 = vld [vmem:[%s3886_s1 + $0xa8] sm:$0xff]  ;;  %v77_v4 = vld [vmem:[%s3886_s1 + $0xb8] sm:$0xff]  ;;  %v112_v7 = vadd.f32 %v72_v0, %v32_v62  ;;  %v34_v8 = vld [vmem:[%s3885_s0 + $0xa0] sm:$0xff] }
  0x10   :  { %1896 = vmatpush1.bf16.msra.mxu0 %v1895_v52  ;;  %1937 = vmatpush1.bf16.msra.mxu1 %v1895_v52  ;;  %v36_v9 = vld [vmem:[%s3885_s0 + $0xb0] sm:$0xff]  ;;  %v1901_v10 = vpack.c.bf16 %v113_v60, %v111_v59  ;;  %v115_v11 = vadd.f32 %v75_v3, %v35_v1  ;;  %v117_v12 = vadd.f32 %v77_v4, %v37_v2  ;;  %v74_v13 = vld [vmem:[%s3886_s1 + $0xa0] sm:$0xff]  ;;  %v39_v15 = vld [vmem:[%s3885_s0 + $0xc8] sm:$0xff] }
  0x11   :  { %1898 = vmatprep.subr.bf16.mxu0 %v1897_v58  ;;  %1928 = vmatprep.subr.bf16.mxu1 %v1897_v58  ;;  %v76_v14 = vld [vmem:[%s3886_s1 + $0xb0] sm:$0xff]  ;;  %v41_v16 = vld [vmem:[%s3885_s0 + $0xd8] sm:$0xff]  ;;  %v79_v17 = vld [vmem:[%s3886_s1 + $0xc8] sm:$0xff]  ;;  %v1903_v19 = vpack.c.bf16 %v112_v7, %v110_v6  ;;  %v114_v20 = vadd.f32 %v74_v13, %v34_v8 }
  0x12   :  { %v81_v18 = vld [vmem:[%s3886_s1 + $0xd8] sm:$0xff]  ;;  %v116_v21 = vadd.f32 %v76_v14, %v36_v9  ;;  %v38_v22 = vld [vmem:[%s3885_s0 + $0xc0] sm:$0xff]  ;;  %v40_v23 = vld [vmem:[%s3885_s0 + $0xd0] sm:$0xff]  ;;  %v1905_v24 = vpack.c.bf16 %v117_v12, %v115_v11  ;;  %v119_v25 = vadd.f32 %v79_v17, %v39_v15 }
  0x13   :  { %v121_v26 = vadd.f32 %v81_v18, %v41_v16  ;;  %v78_v27 = vld [vmem:[%s3886_s1 + $0xc0] sm:$0xff]  ;;  %v80_v28 = vld [vmem:[%s3886_s1 + $0xd0] sm:$0xff]  ;;  %v43_v29 = vld [vmem:[%s3885_s0 + $0xe8] sm:$0xff] }
  0x14   :  { %1900 = vmatpush1.bf16.msra.mxu0 %v1899_v5  ;;  %1938 = vmatpush1.bf16.msra.mxu1 %v1899_v5  ;;  %v45_v30 = vld [vmem:[%s3885_s0 + $0xf8] sm:$0xff]  ;;  %v83_v31 = vld [vmem:[%s3886_s1 + $0xe8] sm:$0xff]  ;;  %v1907_v33 = vpack.c.bf16 %v116_v21, %v114_v20  ;;  %v118_v34 = vadd.f32 %v78_v27, %v38_v22  ;;  %v120_v35 = vadd.f32 %v80_v28, %v40_v23  ;;  %v42_v36 = vld [vmem:[%s3885_s0 + $0xe0] sm:$0xff] }
  0x15   :  { %1902 = vmatprep.subr.bf16.mxu0 %v1901_v10  ;;  %1929 = vmatprep.subr.bf16.mxu1 %v1901_v10  ;;  %v85_v32 = vld [vmem:[%s3886_s1 + $0xf8] sm:$0xff]  ;;  %v44_v37 = vld [vmem:[%s3885_s0 + $0xf0] sm:$0xff]  ;;  %v1909_v38 = vpack.c.bf16 %v121_v26, %v119_v25  ;;  %v123_v39 = vadd.f32 %v83_v31, %v43_v29  ;;  %v82_v41 = vld [vmem:[%s3886_s1 + $0xe0] sm:$0xff] }
  0x16   :  { %v125_v40 = vadd.f32 %v85_v32, %v45_v30  ;;  %v84_v42 = vld [vmem:[%s3886_s1 + $0xf0] sm:$0xff]  ;;  %v47_v43 = vld [vmem:[%s3885_s0 + $0x108] sm:$0xff]  ;;  %v49_v44 = vld [vmem:[%s3885_s0 + $0x118] sm:$0xff]  ;;  %v1911_v48 = vpack.c.bf16 %v120_v35, %v118_v34  ;;  %v122_v49 = vadd.f32 %v82_v41, %v42_v36 }
  0x17   :  { %v87_v45 = vld [vmem:[%s3886_s1 + $0x108] sm:$0xff]  ;;  %v89_v46 = vld [vmem:[%s3886_s1 + $0x118] sm:$0xff]  ;;  %v124_v50 = vadd.f32 %v84_v42, %v44_v37  ;;  %v46_v51 = vld [vmem:[%s3885_s0 + $0x100] sm:$0xff] }
  0x18   :  { %1904 = vmatpush1.bf16.msra.mxu0 %v1903_v19  ;;  %1939 = vmatpush1.bf16.msra.mxu1 %v1903_v19  ;;  %v135_v47 = vld [vmem:[%s3887_s2 + $0x8] sm:$0xff]  ;;  %v48_v52 = vld [vmem:[%s3885_s0 + $0x110] sm:$0xff]  ;;  %v1913_v54 = vpack.c.bf16 %v125_v40, %v123_v39  ;;  %v127_v55 = vadd.f32 %v87_v45, %v47_v43  ;;  %v129_v56 = vadd.f32 %v89_v46, %v49_v44  ;;  %v86_v57 = vld [vmem:[%s3886_s1 + $0x100] sm:$0xff] }
  0x19   :  { %1906 = vmatprep.subr.bf16.mxu0 %v1905_v24  ;;  %1930 = vmatprep.subr.bf16.mxu1 %v1905_v24  ;;  %v255_v53 = vld [vmem:[%s3887_s2 + $0x3c8] sm:$0xff]  ;;  %v88_v58 = vld [vmem:[%s3886_s1 + $0x110] sm:$0xff]  ;;  %v53_v60 = vld [vmem:[%s3885_s0 + $0x138] sm:$0xff]  ;;  %v1915_v63 = vpack.c.bf16 %v124_v50, %v122_v49  ;;  %v126_v0 = vadd.f32 %v86_v57, %v46_v51 }
  0x1a   :  { %v51_v59 = vld [vmem:[%s3885_s0 + $0x128] sm:$0xff]  ;;  %v93_v62 = vld [vmem:[%s3886_s1 + $0x138] sm:$0xff]  ;;  %1765 = vmatprep.mubr.msk.f32.mxu0 %vm374_vm0, %v135_v47  ;;  %1825 = vmatprep.mubr.msk.f32.mxu1 %vm374_vm0, %v255_v53  ;;  %v128_v1 = vadd.f32 %v88_v58, %v48_v52  ;;  %v50_v2 = vld [vmem:[%s3885_s0 + $0x120] sm:$0xff]  ;;  %v1917_v3 = vpack.c.bf16 %v129_v56, %v127_v55 }
  0x1b   :  { %v91_v61 = vld [vmem:[%s3886_s1 + $0x128] sm:$0xff]  ;;  %v133_v5 = vadd.f32 %v93_v62, %v53_v60  ;;  %v52_v6 = vld [vmem:[%s3885_s0 + $0x130] sm:$0xff]  ;;  %v90_v7 = vld [vmem:[%s3886_s1 + $0x120] sm:$0xff] }
  0x1c   :  { %1908 = vmatpush1.bf16.msra.mxu0 %v1907_v33  ;;  %1940 = vmatpush1.bf16.msra.mxu1 %v1907_v33  ;;  %v131_v4 = vadd.f32 %v91_v61, %v51_v59  ;;  %v92_v8 = vld [vmem:[%s3886_s1 + $0x130] sm:$0xff]  ;;  %v1919_v9 = vpack.c.bf16 %v128_v1, %v126_v0  ;;  %v130_v10 = vadd.f32 %v90_v7, %v50_v2  ;;  %v134_v14 = vld [vmem:[%s3887_s2] sm:$0xff]  ;;  %v137_v16 = vld [vmem:[%s3887_s2 + $0x18] sm:$0xff] }
  0x1d   :  { %1910 = vmatprep.subr.bf16.mxu0 %v1909_v38  ;;  %1931 = vmatprep.subr.bf16.mxu1 %v1909_v38  ;;  %v132_v11 = vadd.f32 %v92_v8, %v52_v6  ;;  %v254_v15 = vld [vmem:[%s3887_s2 + $0x3c0] sm:$0xff]  ;;  %v257_v17 = vld [vmem:[%s3887_s2 + $0x3d8] sm:$0xff]  ;;  %v136_v18 = vld [vmem:[%s3887_s2 + $0x10] sm:$0xff] }
  0x1e   :  { %v1921_v12 = vpack.c.bf16 %v133_v5, %v131_v4  ;;  %v256_v19 = vld [vmem:[%s3887_s2 + $0x3d0] sm:$0xff]  ;;  %v139_v20 = vld [vmem:[%s3887_s2 + $0x28] sm:$0xff]  ;;  %v138_v22 = vld [vmem:[%s3887_s2 + $0x20] sm:$0xff] }
  0x1f   :  { %v1923_v13 = vpack.c.bf16 %v132_v11, %v130_v10  ;;  %v259_v21 = vld [vmem:[%s3887_s2 + $0x3e8] sm:$0xff]  ;;  %v258_v23 = vld [vmem:[%s3887_s2 + $0x3e0] sm:$0xff]  ;;  %v141_v24 = vld [vmem:[%s3887_s2 + $0x38] sm:$0xff] }
  0x20   :  { %1912 = vmatpush1.bf16.msra.mxu0 %v1911_v48  ;;  %1941 = vmatpush1.bf16.msra.mxu1 %v1911_v48  ;;  %v261_v25 = vld [vmem:[%s3887_s2 + $0x3f8] sm:$0xff]  ;;  %v140_v26 = vld [vmem:[%s3887_s2 + $0x30] sm:$0xff]  ;;  %v143_v28 = vld [vmem:[%s3887_s2 + $0x48] sm:$0xff] }
  0x21   :  { %1914 = vmatprep.subr.bf16.mxu0 %v1913_v54  ;;  %1932 = vmatprep.subr.bf16.mxu1 %v1913_v54  ;;  %v260_v27 = vld [vmem:[%s3887_s2 + $0x3f0] sm:$0xff]  ;;  %v263_v29 = vld [vmem:[%s3887_s2 + $0x408] sm:$0xff]  ;;  %v142_v30 = vld [vmem:[%s3887_s2 + $0x40] sm:$0xff] }
  0x22   :  { %v262_v31 = vld [vmem:[%s3887_s2 + $0x400] sm:$0xff]  ;;  %v145_v32 = vld [vmem:[%s3887_s2 + $0x58] sm:$0xff]  ;;  %v144_v34 = vld [vmem:[%s3887_s2 + $0x50] sm:$0xff] }
  0x23   :  { %v265_v33 = vld [vmem:[%s3887_s2 + $0x418] sm:$0xff]  ;;  %v264_v35 = vld [vmem:[%s3887_s2 + $0x410] sm:$0xff]  ;;  %v147_v36 = vld [vmem:[%s3887_s2 + $0x68] sm:$0xff] }
  0x24   :  { %1916 = vmatpush1.bf16.msra.mxu0 %v1915_v63  ;;  %1942 = vmatpush1.bf16.msra.mxu1 %v1915_v63  ;;  %v267_v37 = vld [vmem:[%s3887_s2 + $0x428] sm:$0xff]  ;;  %v146_v38 = vld [vmem:[%s3887_s2 + $0x60] sm:$0xff]  ;;  %v149_v40 = vld [vmem:[%s3887_s2 + $0x78] sm:$0xff] }
  0x25   :  { %1918 = vmatprep.subr.bf16.mxu0 %v1917_v3  ;;  %1933 = vmatprep.subr.bf16.mxu1 %v1917_v3  ;;  %v266_v39 = vld [vmem:[%s3887_s2 + $0x420] sm:$0xff]  ;;  %v269_v41 = vld [vmem:[%s3887_s2 + $0x438] sm:$0xff]  ;;  %v148_v42 = vld [vmem:[%s3887_s2 + $0x70] sm:$0xff] }
  0x26   :  { %v268_v43 = vld [vmem:[%s3887_s2 + $0x430] sm:$0xff]  ;;  %v151_v44 = vld [vmem:[%s3887_s2 + $0x88] sm:$0xff]  ;;  %v150_v46 = vld [vmem:[%s3887_s2 + $0x80] sm:$0xff] }
  0x27   :  { %v271_v45 = vld [vmem:[%s3887_s2 + $0x448] sm:$0xff]  ;;  %v270_v47 = vld [vmem:[%s3887_s2 + $0x440] sm:$0xff]  ;;  %v153_v48 = vld [vmem:[%s3887_s2 + $0x98] sm:$0xff] }
  0x28   :  { %1920 = vmatpush1.bf16.msra.mxu0 %v1919_v9  ;;  %1943 = vmatpush1.bf16.msra.mxu1 %v1919_v9  ;;  %v273_v49 = vld [vmem:[%s3887_s2 + $0x458] sm:$0xff]  ;;  %v152_v50 = vld [vmem:[%s3887_s2 + $0x90] sm:$0xff]  ;;  %v155_v52 = vld [vmem:[%s3887_s2 + $0xa8] sm:$0xff] }
  0x29   :  { %1922 = vmatprep.subr.bf16.mxu0 %v1921_v12  ;;  %1934 = vmatprep.subr.bf16.mxu1 %v1921_v12  ;;  %v272_v51 = vld [vmem:[%s3887_s2 + $0x450] sm:$0xff]  ;;  %v275_v53 = vld [vmem:[%s3887_s2 + $0x468] sm:$0xff]  ;;  %v154_v54 = vld [vmem:[%s3887_s2 + $0xa0] sm:$0xff] }
  0x2a   :  { %v274_v55 = vld [vmem:[%s3887_s2 + $0x460] sm:$0xff]  ;;  %v157_v56 = vld [vmem:[%s3887_s2 + $0xb8] sm:$0xff]  ;;  %v156_v58 = vld [vmem:[%s3887_s2 + $0xb0] sm:$0xff] }
  0x2b   :  { %v277_v57 = vld [vmem:[%s3887_s2 + $0x478] sm:$0xff]  ;;  %v276_v59 = vld [vmem:[%s3887_s2 + $0x470] sm:$0xff]  ;;  %v159_v60 = vld [vmem:[%s3887_s2 + $0xc8] sm:$0xff] }
  0x2c   :  { %1924 = vmatpush1.bf16.msra.mxu0 %v1923_v13  ;;  %1944 = vmatpush1.bf16.msra.mxu1 %v1923_v13  ;;  %v279_v61 = vld [vmem:[%s3887_s2 + $0x488] sm:$0xff]  ;;  %v158_v62 = vld [vmem:[%s3887_s2 + $0xc0] sm:$0xff]  ;;  %v161_v0 = vld [vmem:[%s3887_s2 + $0xd8] sm:$0xff] }
  0x2d   :  { %v278_v63 = vld [vmem:[%s3887_s2 + $0x480] sm:$0xff]  ;;  %v281_v1 = vld [vmem:[%s3887_s2 + $0x498] sm:$0xff]  ;;  %v160_v2 = vld [vmem:[%s3887_s2 + $0xd0] sm:$0xff] }
  0x2e   :  { %v280_v3 = vld [vmem:[%s3887_s2 + $0x490] sm:$0xff]  ;;  %v163_v4 = vld [vmem:[%s3887_s2 + $0xe8] sm:$0xff]  ;;  %v162_v6 = vld [vmem:[%s3887_s2 + $0xe0] sm:$0xff] }
  0x2f   :  { %800 = vmatmul.mubr.f32.vlgmr.msra.gmra.mrb[0].mxu0 %v134_v14  ;;  %1160 = vmatmul.mubr.f32.vlgmr.msra.gmra.mrb[0].mxu1 %v254_v15  ;;  %v283_v5 = vld [vmem:[%s3887_s2 + $0x4a8] sm:$0xff]  ;;  %v282_v7 = vld [vmem:[%s3887_s2 + $0x4a0] sm:$0xff]  ;;  %v165_v8 = vld [vmem:[%s3887_s2 + $0xf8] sm:$0xff] }
  0x30   :  { %1766 = vmatprep.mubr.msk.f32.mxu0 %vm374_vm0, %v137_v16  ;;  %1826 = vmatprep.mubr.msk.f32.mxu1 %vm374_vm0, %v257_v17  ;;  %v285_v9 = vld [vmem:[%s3887_s2 + $0x4b8] sm:$0xff]  ;;  %v164_v10 = vld [vmem:[%s3887_s2 + $0xf0] sm:$0xff]  ;;  %v167_v12 = vld [vmem:[%s3887_s2 + $0x108] sm:$0xff] }
  0x31   :  { %v284_v11 = vld [vmem:[%s3887_s2 + $0x4b0] sm:$0xff]  ;;  %v287_v13 = vld [vmem:[%s3887_s2 + $0x4c8] sm:$0xff]  ;;  %v166_v14 = vld [vmem:[%s3887_s2 + $0x100] sm:$0xff] }
  0x32   :  { %v286_v15 = vld [vmem:[%s3887_s2 + $0x4c0] sm:$0xff]  ;;  %v169_v16 = vld [vmem:[%s3887_s2 + $0x118] sm:$0xff] }
  0x33   :  { %806 = vmatmul.mubr.f32.gmra.mrb[2].mxu0 %v136_v18  ;;  %1166 = vmatmul.mubr.f32.gmra.mrb[2].mxu1 %v256_v19  ;;  %v289_v17 = vld [vmem:[%s3887_s2 + $0x4d8] sm:$0xff]  ;;  %v168_v18 = vld [vmem:[%s3887_s2 + $0x110] sm:$0xff] }
  0x34   :  { %1767 = vmatprep.mubr.msk.f32.mxu0 %vm374_vm0, %v139_v20  ;;  %1827 = vmatprep.mubr.msk.f32.mxu1 %vm374_vm0, %v259_v21  ;;  %v288_v19 = vld [vmem:[%s3887_s2 + $0x4d0] sm:$0xff]  ;;  %v171_v20 = vld [vmem:[%s3887_s2 + $0x128] sm:$0xff] }
  0x35   :  { %v291_v21 = vld [vmem:[%s3887_s2 + $0x4e8] sm:$0xff] }
  0x37   :  { %812 = vmatmul.mubr.f32.gmra.mrb[4].mxu0 %v138_v22  ;;  %1172 = vmatmul.mubr.f32.gmra.mrb[4].mxu1 %v258_v23  ;;  %v170_v22 = vld [vmem:[%s3887_s2 + $0x120] sm:$0xff] }
  0x38   :  { %1768 = vmatprep.mubr.msk.f32.mxu0 %vm374_vm0, %v141_v24  ;;  %1828 = vmatprep.mubr.msk.f32.mxu1 %vm374_vm0, %v261_v25  ;;  %v290_v23 = vld [vmem:[%s3887_s2 + $0x4e0] sm:$0xff]  ;;  %v173_v24 = vld [vmem:[%s3887_s2 + $0x138] sm:$0xff] }
  0x39   :  { %v293_v25 = vld [vmem:[%s3887_s2 + $0x4f8] sm:$0xff] }
  0x3b   :  { %818 = vmatmul.mubr.f32.gmra.mrb[6].mxu0 %v140_v26  ;;  %1178 = vmatmul.mubr.f32.gmra.mrb[6].mxu1 %v260_v27  ;;  %v172_v26 = vld [vmem:[%s3887_s2 + $0x130] sm:$0xff] }
  0x3c   :  { %1769 = vmatprep.mubr.msk.f32.mxu0 %vm374_vm0, %v143_v28  ;;  %1829 = vmatprep.mubr.msk.f32.mxu1 %vm374_vm0, %v263_v29  ;;  %v292_v27 = vld [vmem:[%s3887_s2 + $0x4f0] sm:$0xff]  ;;  %v175_v28 = vld [vmem:[%s3887_s2 + $0x148] sm:$0xff] }
  0x3d   :  { %v295_v29 = vld [vmem:[%s3887_s2 + $0x508] sm:$0xff] }
  0x3f   :  { %824 = vmatmul.mubr.f32.gmra.mrb[8].mxu0 %v142_v30  ;;  %1184 = vmatmul.mubr.f32.gmra.mrb[8].mxu1 %v262_v31  ;;  %v174_v30 = vld [vmem:[%s3887_s2 + $0x140] sm:$0xff] }
  0x40   :  { %1770 = vmatprep.mubr.msk.f32.mxu0 %vm374_vm0, %v145_v32  ;;  %1830 = vmatprep.mubr.msk.f32.mxu1 %vm374_vm0, %v265_v33  ;;  %v294_v31 = vld [vmem:[%s3887_s2 + $0x500] sm:$0xff]  ;;  %v177_v32 = vld [vmem:[%s3887_s2 + $0x158] sm:$0xff] }
  0x41   :  { %v297_v33 = vld [vmem:[%s3887_s2 + $0x518] sm:$0xff] }
  0x43   :  { %830 = vmatmul.mubr.f32.gmra.mrb[10].mxu0 %v144_v34  ;;  %1190 = vmatmul.mubr.f32.gmra.mrb[10].mxu1 %v264_v35  ;;  %v176_v34 = vld [vmem:[%s3887_s2 + $0x150] sm:$0xff] }
  0x44   :  { %1771 = vmatprep.mubr.msk.f32.mxu0 %vm374_vm0, %v147_v36  ;;  %1831 = vmatprep.mubr.msk.f32.mxu1 %vm374_vm0, %v267_v37  ;;  %v296_v35 = vld [vmem:[%s3887_s2 + $0x510] sm:$0xff]  ;;  %v179_v36 = vld [vmem:[%s3887_s2 + $0x168] sm:$0xff] }
  0x45   :  { %v299_v37 = vld [vmem:[%s3887_s2 + $0x528] sm:$0xff] }
  0x47   :  { %836 = vmatmul.mubr.f32.gmra.mrb[12].mxu0 %v146_v38  ;;  %1196 = vmatmul.mubr.f32.gmra.mrb[12].mxu1 %v266_v39  ;;  %v178_v38 = vld [vmem:[%s3887_s2 + $0x160] sm:$0xff] }
  0x48   :  { %1772 = vmatprep.mubr.msk.f32.mxu0 %vm374_vm0, %v149_v40  ;;  %1832 = vmatprep.mubr.msk.f32.mxu1 %vm374_vm0, %v269_v41  ;;  %v298_v39 = vld [vmem:[%s3887_s2 + $0x520] sm:$0xff]  ;;  %v181_v40 = vld [vmem:[%s3887_s2 + $0x178] sm:$0xff] }
  0x49   :  { %v301_v41 = vld [vmem:[%s3887_s2 + $0x538] sm:$0xff] }
  0x4b   :  { %842 = vmatmul.mubr.f32.gmra.mrb[14].mxu0 %v148_v42  ;;  %1202 = vmatmul.mubr.f32.gmra.mrb[14].mxu1 %v268_v43  ;;  %v180_v42 = vld [vmem:[%s3887_s2 + $0x170] sm:$0xff] }
  0x4c   :  { %1773 = vmatprep.mubr.msk.f32.mxu0 %vm374_vm0, %v151_v44  ;;  %1833 = vmatprep.mubr.msk.f32.mxu1 %vm374_vm0, %v271_v45  ;;  %v300_v43 = vld [vmem:[%s3887_s2 + $0x530] sm:$0xff]  ;;  %v183_v44 = vld [vmem:[%s3887_s2 + $0x188] sm:$0xff] }
  0x4d   :  { %v303_v45 = vld [vmem:[%s3887_s2 + $0x548] sm:$0xff] }
  0x4f   :  { %848 = vmatmul.mubr.f32.gmra.mrb[16].mxu0 %v150_v46  ;;  %1208 = vmatmul.mubr.f32.gmra.mrb[16].mxu1 %v270_v47  ;;  %v182_v46 = vld [vmem:[%s3887_s2 + $0x180] sm:$0xff] }
  0x50   :  { %1774 = vmatprep.mubr.msk.f32.mxu0 %vm374_vm0, %v153_v48  ;;  %1834 = vmatprep.mubr.msk.f32.mxu1 %vm374_vm0, %v273_v49  ;;  %v302_v47 = vld [vmem:[%s3887_s2 + $0x540] sm:$0xff]  ;;  %v185_v48 = vld [vmem:[%s3887_s2 + $0x198] sm:$0xff] }
  0x51   :  { %v305_v49 = vld [vmem:[%s3887_s2 + $0x558] sm:$0xff] }
  0x53   :  { %854 = vmatmul.mubr.f32.gmra.mrb[18].mxu0 %v152_v50  ;;  %1214 = vmatmul.mubr.f32.gmra.mrb[18].mxu1 %v272_v51  ;;  %v184_v50 = vld [vmem:[%s3887_s2 + $0x190] sm:$0xff] }
  0x54   :  { %1775 = vmatprep.mubr.msk.f32.mxu0 %vm374_vm0, %v155_v52  ;;  %1835 = vmatprep.mubr.msk.f32.mxu1 %vm374_vm0, %v275_v53  ;;  %v304_v51 = vld [vmem:[%s3887_s2 + $0x550] sm:$0xff]  ;;  %v187_v52 = vld [vmem:[%s3887_s2 + $0x1a8] sm:$0xff] }
  0x55   :  { %v307_v53 = vld [vmem:[%s3887_s2 + $0x568] sm:$0xff] }
  0x57   :  { %860 = vmatmul.mubr.f32.gmra.mrb[20].mxu0 %v154_v54  ;;  %1220 = vmatmul.mubr.f32.gmra.mrb[20].mxu1 %v274_v55  ;;  %v186_v54 = vld [vmem:[%s3887_s2 + $0x1a0] sm:$0xff] }
  0x58   :  { %1776 = vmatprep.mubr.msk.f32.mxu0 %vm374_vm0, %v157_v56  ;;  %1836 = vmatprep.mubr.msk.f32.mxu1 %vm374_vm0, %v277_v57  ;;  %v306_v55 = vld [vmem:[%s3887_s2 + $0x560] sm:$0xff]  ;;  %v189_v56 = vld [vmem:[%s3887_s2 + $0x1b8] sm:$0xff] }
  0x59   :  { %v309_v57 = vld [vmem:[%s3887_s2 + $0x578] sm:$0xff] }
  0x5b   :  { %866 = vmatmul.mubr.f32.gmra.mrb[22].mxu0 %v156_v58  ;;  %1226 = vmatmul.mubr.f32.gmra.mrb[22].mxu1 %v276_v59  ;;  %v188_v58 = vld [vmem:[%s3887_s2 + $0x1b0] sm:$0xff] }
  0x5c   :  { %1777 = vmatprep.mubr.msk.f32.mxu0 %vm374_vm0, %v159_v60  ;;  %1837 = vmatprep.mubr.msk.f32.mxu1 %vm374_vm0, %v279_v61  ;;  %v308_v59 = vld [vmem:[%s3887_s2 + $0x570] sm:$0xff]  ;;  %v191_v60 = vld [vmem:[%s3887_s2 + $0x1c8] sm:$0xff] }
  0x5d   :  { %v311_v61 = vld [vmem:[%s3887_s2 + $0x588] sm:$0xff] }
  0x5f   :  { %872 = vmatmul.mubr.f32.gmra.mrb[24].mxu0 %v158_v62  ;;  %1232 = vmatmul.mubr.f32.gmra.mrb[24].mxu1 %v278_v63  ;;  %v190_v62 = vld [vmem:[%s3887_s2 + $0x1c0] sm:$0xff] }
  0x60   :  { %1778 = vmatprep.mubr.msk.f32.mxu0 %vm374_vm0, %v161_v0  ;;  %1838 = vmatprep.mubr.msk.f32.mxu1 %vm374_vm0, %v281_v1  ;;  %v310_v63 = vld [vmem:[%s3887_s2 + $0x580] sm:$0xff]  ;;  %v193_v0 = vld [vmem:[%s3887_s2 + $0x1d8] sm:$0xff] }
  0x61   :  { %v313_v1 = vld [vmem:[%s3887_s2 + $0x598] sm:$0xff] }
  0x63   :  { %878 = vmatmul.mubr.f32.gmra.mrb[26].mxu0 %v160_v2  ;;  %1238 = vmatmul.mubr.f32.gmra.mrb[26].mxu1 %v280_v3  ;;  %v192_v2 = vld [vmem:[%s3887_s2 + $0x1d0] sm:$0xff] }
  0x64   :  { %1779 = vmatprep.mubr.msk.f32.mxu0 %vm374_vm0, %v163_v4  ;;  %1839 = vmatprep.mubr.msk.f32.mxu1 %vm374_vm0, %v283_v5  ;;  %v312_v3 = vld [vmem:[%s3887_s2 + $0x590] sm:$0xff]  ;;  %v195_v4 = vld [vmem:[%s3887_s2 + $0x1e8] sm:$0xff] }
  0x65   :  { %v315_v5 = vld [vmem:[%s3887_s2 + $0x5a8] sm:$0xff] }
  0x67   :  { %884 = vmatmul.mubr.f32.gmra.mrb[28].mxu0 %v162_v6  ;;  %1244 = vmatmul.mubr.f32.gmra.mrb[28].mxu1 %v282_v7  ;;  %v194_v6 = vld [vmem:[%s3887_s2 + $0x1e0] sm:$0xff] }
  0x68   :  { %1780 = vmatprep.mubr.msk.f32.mxu0 %vm374_vm0, %v165_v8  ;;  %1840 = vmatprep.mubr.msk.f32.mxu1 %vm374_vm0, %v285_v9  ;;  %v314_v7 = vld [vmem:[%s3887_s2 + $0x5a0] sm:$0xff]  ;;  %v197_v8 = vld [vmem:[%s3887_s2 + $0x1f8] sm:$0xff] }
  0x69   :  { %v317_v9 = vld [vmem:[%s3887_s2 + $0x5b8] sm:$0xff] }
  0x6b   :  { %890 = vmatmul.mubr.f32.gmra.mrb[30].mxu0 %v164_v10  ;;  %1250 = vmatmul.mubr.f32.gmra.mrb[30].mxu1 %v284_v11  ;;  %v196_v10 = vld [vmem:[%s3887_s2 + $0x1f0] sm:$0xff] }
  0x6c   :  { %1781 = vmatprep.mubr.msk.f32.mxu0 %vm374_vm0, %v167_v12  ;;  %1841 = vmatprep.mubr.msk.f32.mxu1 %vm374_vm0, %v287_v13  ;;  %v316_v11 = vld [vmem:[%s3887_s2 + $0x5b0] sm:$0xff]  ;;  %v199_v12 = vld [vmem:[%s3887_s2 + $0x208] sm:$0xff] }
  0x6d   :  { %v319_v13 = vld [vmem:[%s3887_s2 + $0x5c8] sm:$0xff] }
  0x6f   :  { %896 = vmatmul.mubr.f32.gmra.mrb[32].mxu0 %v166_v14  ;;  %1256 = vmatmul.mubr.f32.gmra.mrb[32].mxu1 %v286_v15  ;;  %v198_v14 = vld [vmem:[%s3887_s2 + $0x200] sm:$0xff] }
  0x70   :  { %1782 = vmatprep.mubr.msk.f32.mxu0 %vm374_vm0, %v169_v16  ;;  %1842 = vmatprep.mubr.msk.f32.mxu1 %vm374_vm0, %v289_v17  ;;  %v318_v15 = vld [vmem:[%s3887_s2 + $0x5c0] sm:$0xff]  ;;  %v201_v16 = vld [vmem:[%s3887_s2 + $0x218] sm:$0xff] }
  0x71   :  { %v321_v17 = vld [vmem:[%s3887_s2 + $0x5d8] sm:$0xff] }
  0x73   :  { %902 = vmatmul.mubr.f32.gmra.mrb[34].mxu0 %v168_v18  ;;  %1262 = vmatmul.mubr.f32.gmra.mrb[34].mxu1 %v288_v19  ;;  %v200_v18 = vld [vmem:[%s3887_s2 + $0x210] sm:$0xff] }
  0x74   :  { %1783 = vmatprep.mubr.msk.f32.mxu0 %vm374_vm0, %v171_v20  ;;  %1843 = vmatprep.mubr.msk.f32.mxu1 %vm374_vm0, %v291_v21  ;;  %v320_v19 = vld [vmem:[%s3887_s2 + $0x5d0] sm:$0xff]  ;;  %v203_v20 = vld [vmem:[%s3887_s2 + $0x228] sm:$0xff] }
  0x75   :  { %v323_v21 = vld [vmem:[%s3887_s2 + $0x5e8] sm:$0xff] }
  0x77   :  { %908 = vmatmul.mubr.f32.gmra.mrb[36].mxu0 %v170_v22  ;;  %1268 = vmatmul.mubr.f32.gmra.mrb[36].mxu1 %v290_v23  ;;  %v202_v22 = vld [vmem:[%s3887_s2 + $0x220] sm:$0xff] }
  0x78   :  { %1784 = vmatprep.mubr.msk.f32.mxu0 %vm374_vm0, %v173_v24  ;;  %1844 = vmatprep.mubr.msk.f32.mxu1 %vm374_vm0, %v293_v25  ;;  %v322_v23 = vld [vmem:[%s3887_s2 + $0x5e0] sm:$0xff]  ;;  %v205_v24 = vld [vmem:[%s3887_s2 + $0x238] sm:$0xff] }
  0x79   :  { %v325_v25 = vld [vmem:[%s3887_s2 + $0x5f8] sm:$0xff] }
  0x7b   :  { %914 = vmatmul.mubr.f32.gmra.mrb[38].mxu0 %v172_v26  ;;  %1274 = vmatmul.mubr.f32.gmra.mrb[38].mxu1 %v292_v27  ;;  %v204_v26 = vld [vmem:[%s3887_s2 + $0x230] sm:$0xff] }
  0x7c   :  { %1785 = vmatprep.mubr.msk.f32.mxu0 %vm374_vm0, %v175_v28  ;;  %1845 = vmatprep.mubr.msk.f32.mxu1 %vm374_vm0, %v295_v29  ;;  %v324_v27 = vld [vmem:[%s3887_s2 + $0x5f0] sm:$0xff]  ;;  %v207_v28 = vld [vmem:[%s3887_s2 + $0x248] sm:$0xff] }
  0x7d   :  { %v327_v29 = vld [vmem:[%s3887_s2 + $0x608] sm:$0xff] }
  0x7f   :  { %920 = vmatmul.mubr.f32.gmra.mrb[40].mxu0 %v174_v30  ;;  %1280 = vmatmul.mubr.f32.gmra.mrb[40].mxu1 %v294_v31  ;;  %v206_v30 = vld [vmem:[%s3887_s2 + $0x240] sm:$0xff] }
  0x80   :  { %1786 = vmatprep.mubr.msk.f32.mxu0 %vm374_vm0, %v177_v32  ;;  %1846 = vmatprep.mubr.msk.f32.mxu1 %vm374_vm0, %v297_v33  ;;  %v326_v31 = vld [vmem:[%s3887_s2 + $0x600] sm:$0xff]  ;;  %v209_v32 = vld [vmem:[%s3887_s2 + $0x258] sm:$0xff] }
  0x81   :  { %v329_v33 = vld [vmem:[%s3887_s2 + $0x618] sm:$0xff] }
  0x83   :  { %926 = vmatmul.mubr.f32.gmra.mrb[42].mxu0 %v176_v34  ;;  %1286 = vmatmul.mubr.f32.gmra.mrb[42].mxu1 %v296_v35  ;;  %v208_v34 = vld [vmem:[%s3887_s2 + $0x250] sm:$0xff] }
  0x84   :  { %1787 = vmatprep.mubr.msk.f32.mxu0 %vm374_vm0, %v179_v36  ;;  %1847 = vmatprep.mubr.msk.f32.mxu1 %vm374_vm0, %v299_v37  ;;  %v328_v35 = vld [vmem:[%s3887_s2 + $0x610] sm:$0xff]  ;;  %v211_v36 = vld [vmem:[%s3887_s2 + $0x268] sm:$0xff] }
  0x85   :  { %v331_v37 = vld [vmem:[%s3887_s2 + $0x628] sm:$0xff] }
  0x87   :  { %932 = vmatmul.mubr.f32.gmra.mrb[44].mxu0 %v178_v38  ;;  %1292 = vmatmul.mubr.f32.gmra.mrb[44].mxu1 %v298_v39  ;;  %v210_v38 = vld [vmem:[%s3887_s2 + $0x260] sm:$0xff] }
  0x88   :  { %1788 = vmatprep.mubr.msk.f32.mxu0 %vm374_vm0, %v181_v40  ;;  %1848 = vmatprep.mubr.msk.f32.mxu1 %vm374_vm0, %v301_v41  ;;  %v330_v39 = vld [vmem:[%s3887_s2 + $0x620] sm:$0xff]  ;;  %v213_v40 = vld [vmem:[%s3887_s2 + $0x278] sm:$0xff] }
  0x89   :  { %v333_v41 = vld [vmem:[%s3887_s2 + $0x638] sm:$0xff] }
  0x8b   :  { %938 = vmatmul.mubr.f32.gmra.mrb[46].mxu0 %v180_v42  ;;  %1298 = vmatmul.mubr.f32.gmra.mrb[46].mxu1 %v300_v43  ;;  %v212_v42 = vld [vmem:[%s3887_s2 + $0x270] sm:$0xff] }
  0x8c   :  { %1789 = vmatprep.mubr.msk.f32.mxu0 %vm374_vm0, %v183_v44  ;;  %1849 = vmatprep.mubr.msk.f32.mxu1 %vm374_vm0, %v303_v45  ;;  %v332_v43 = vld [vmem:[%s3887_s2 + $0x630] sm:$0xff]  ;;  %v215_v44 = vld [vmem:[%s3887_s2 + $0x288] sm:$0xff] }
  0x8d   :  { %v335_v45 = vld [vmem:[%s3887_s2 + $0x648] sm:$0xff] }
  0x8f   :  { %944 = vmatmul.mubr.f32.gmra.mrb[48].mxu0 %v182_v46  ;;  %1304 = vmatmul.mubr.f32.gmra.mrb[48].mxu1 %v302_v47  ;;  %v214_v46 = vld [vmem:[%s3887_s2 + $0x280] sm:$0xff] }
  0x90   :  { %1790 = vmatprep.mubr.msk.f32.mxu0 %vm374_vm0, %v185_v48  ;;  %1850 = vmatprep.mubr.msk.f32.mxu1 %vm374_vm0, %v305_v49  ;;  %v334_v47 = vld [vmem:[%s3887_s2 + $0x640] sm:$0xff]  ;;  %v217_v48 = vld [vmem:[%s3887_s2 + $0x298] sm:$0xff] }
  0x91   :  { %v337_v49 = vld [vmem:[%s3887_s2 + $0x658] sm:$0xff] }
  0x93   :  { %950 = vmatmul.mubr.f32.gmra.mrb[50].mxu0 %v184_v50  ;;  %1310 = vmatmul.mubr.f32.gmra.mrb[50].mxu1 %v304_v51  ;;  %v216_v50 = vld [vmem:[%s3887_s2 + $0x290] sm:$0xff] }
  0x94   :  { %1791 = vmatprep.mubr.msk.f32.mxu0 %vm374_vm0, %v187_v52  ;;  %1851 = vmatprep.mubr.msk.f32.mxu1 %vm374_vm0, %v307_v53  ;;  %v336_v51 = vld [vmem:[%s3887_s2 + $0x650] sm:$0xff]  ;;  %v219_v52 = vld [vmem:[%s3887_s2 + $0x2a8] sm:$0xff] }
  0x95   :  { %v339_v53 = vld [vmem:[%s3887_s2 + $0x668] sm:$0xff] }
  0x97   :  { %956 = vmatmul.mubr.f32.gmra.mrb[52].mxu0 %v186_v54  ;;  %1316 = vmatmul.mubr.f32.gmra.mrb[52].mxu1 %v306_v55  ;;  %v218_v54 = vld [vmem:[%s3887_s2 + $0x2a0] sm:$0xff] }
  0x98   :  { %1792 = vmatprep.mubr.msk.f32.mxu0 %vm374_vm0, %v189_v56  ;;  %1852 = vmatprep.mubr.msk.f32.mxu1 %vm374_vm0, %v309_v57  ;;  %v338_v55 = vld [vmem:[%s3887_s2 + $0x660] sm:$0xff]  ;;  %v221_v56 = vld [vmem:[%s3887_s2 + $0x2b8] sm:$0xff] }
  0x99   :  { %v341_v57 = vld [vmem:[%s3887_s2 + $0x678] sm:$0xff] }
  0x9b   :  { %962 = vmatmul.mubr.f32.gmra.mrb[54].mxu0 %v188_v58  ;;  %1322 = vmatmul.mubr.f32.gmra.mrb[54].mxu1 %v308_v59  ;;  %v220_v58 = vld [vmem:[%s3887_s2 + $0x2b0] sm:$0xff] }
  0x9c   :  { %1793 = vmatprep.mubr.msk.f32.mxu0 %vm374_vm0, %v191_v60  ;;  %1853 = vmatprep.mubr.msk.f32.mxu1 %vm374_vm0, %v311_v61  ;;  %v340_v59 = vld [vmem:[%s3887_s2 + $0x670] sm:$0xff]  ;;  %v223_v60 = vld [vmem:[%s3887_s2 + $0x2c8] sm:$0xff] }
  0x9d   :  { %v343_v61 = vld [vmem:[%s3887_s2 + $0x688] sm:$0xff] }
  0x9f   :  { %968 = vmatmul.mubr.f32.gmra.mrb[56].mxu0 %v190_v62  ;;  %1328 = vmatmul.mubr.f32.gmra.mrb[56].mxu1 %v310_v63  ;;  %v222_v62 = vld [vmem:[%s3887_s2 + $0x2c0] sm:$0xff] }
  0xa0   :  { %1794 = vmatprep.mubr.msk.f32.mxu0 %vm374_vm0, %v193_v0  ;;  %1854 = vmatprep.mubr.msk.f32.mxu1 %vm374_vm0, %v313_v1  ;;  %v342_v63 = vld [vmem:[%s3887_s2 + $0x680] sm:$0xff]  ;;  %v225_v0 = vld [vmem:[%s3887_s2 + $0x2d8] sm:$0xff] }
  0xa1   :  { %v345_v1 = vld [vmem:[%s3887_s2 + $0x698] sm:$0xff] }
  0xa3   :  { %974 = vmatmul.mubr.f32.gmra.mrb[58].mxu0 %v192_v2  ;;  %1334 = vmatmul.mubr.f32.gmra.mrb[58].mxu1 %v312_v3  ;;  %v224_v2 = vld [vmem:[%s3887_s2 + $0x2d0] sm:$0xff] }
  0xa4   :  { %1795 = vmatprep.mubr.msk.f32.mxu0 %vm374_vm0, %v195_v4  ;;  %1855 = vmatprep.mubr.msk.f32.mxu1 %vm374_vm0, %v315_v5  ;;  %v344_v3 = vld [vmem:[%s3887_s2 + $0x690] sm:$0xff]  ;;  %v227_v4 = vld [vmem:[%s3887_s2 + $0x2e8] sm:$0xff] }
  0xa5   :  { %v347_v5 = vld [vmem:[%s3887_s2 + $0x6a8] sm:$0xff] }
  0xa7   :  { %980 = vmatmul.mubr.f32.gmra.mrb[60].mxu0 %v194_v6  ;;  %1340 = vmatmul.mubr.f32.gmra.mrb[60].mxu1 %v314_v7  ;;  %v226_v6 = vld [vmem:[%s3887_s2 + $0x2e0] sm:$0xff] }
  0xa8   :  { %1796 = vmatprep.mubr.msk.f32.mxu0 %vm374_vm0, %v197_v8  ;;  %1856 = vmatprep.mubr.msk.f32.mxu1 %vm374_vm0, %v317_v9  ;;  %v346_v7 = vld [vmem:[%s3887_s2 + $0x6a0] sm:$0xff]  ;;  %v229_v8 = vld [vmem:[%s3887_s2 + $0x2f8] sm:$0xff] }
  0xa9   :  { %v349_v9 = vld [vmem:[%s3887_s2 + $0x6b8] sm:$0xff] }
  0xab   :  { %986 = vmatmul.mubr.f32.gmra.mrb[62].mxu0 %v196_v10  ;;  %1346 = vmatmul.mubr.f32.gmra.mrb[62].mxu1 %v316_v11  ;;  %v228_v10 = vld [vmem:[%s3887_s2 + $0x2f0] sm:$0xff] }
  0xac   :  { %1797 = vmatprep.mubr.msk.f32.mxu0 %vm374_vm0, %v199_v12  ;;  %1857 = vmatprep.mubr.msk.f32.mxu1 %vm374_vm0, %v319_v13  ;;  %v348_v11 = vld [vmem:[%s3887_s2 + $0x6b0] sm:$0xff]  ;;  %v231_v12 = vld [vmem:[%s3887_s2 + $0x308] sm:$0xff] }
  0xad   :  { %v351_v13 = vld [vmem:[%s3887_s2 + $0x6c8] sm:$0xff] }
  0xaf   :  { %992 = vmatmul.mubr.f32.gmra.mrb[64].mxu0 %v198_v14  ;;  %1352 = vmatmul.mubr.f32.gmra.mrb[64].mxu1 %v318_v15  ;;  %v230_v14 = vld [vmem:[%s3887_s2 + $0x300] sm:$0xff] }
  0xb0   :  { %1798 = vmatprep.mubr.msk.f32.mxu0 %vm374_vm0, %v201_v16  ;;  %1858 = vmatprep.mubr.msk.f32.mxu1 %vm374_vm0, %v321_v17  ;;  %v350_v15 = vld [vmem:[%s3887_s2 + $0x6c0] sm:$0xff]  ;;  %v233_v16 = vld [vmem:[%s3887_s2 + $0x318] sm:$0xff] }
  0xb1   :  { %v353_v17 = vld [vmem:[%s3887_s2 + $0x6d8] sm:$0xff] }
  0xb3   :  { %998 = vmatmul.mubr.f32.gmra.mrb[66].mxu0 %v200_v18  ;;  %1358 = vmatmul.mubr.f32.gmra.mrb[66].mxu1 %v320_v19  ;;  %v232_v18 = vld [vmem:[%s3887_s2 + $0x310] sm:$0xff] }
  0xb4   :  { %1799 = vmatprep.mubr.msk.f32.mxu0 %vm374_vm0, %v203_v20  ;;  %1859 = vmatprep.mubr.msk.f32.mxu1 %vm374_vm0, %v323_v21  ;;  %v352_v19 = vld [vmem:[%s3887_s2 + $0x6d0] sm:$0xff]  ;;  %v235_v20 = vld [vmem:[%s3887_s2 + $0x328] sm:$0xff] }
  0xb5   :  { %v355_v21 = vld [vmem:[%s3887_s2 + $0x6e8] sm:$0xff] }
  0xb7   :  { %1004 = vmatmul.mubr.f32.gmra.mrb[68].mxu0 %v202_v22  ;;  %1364 = vmatmul.mubr.f32.gmra.mrb[68].mxu1 %v322_v23  ;;  %v234_v22 = vld [vmem:[%s3887_s2 + $0x320] sm:$0xff] }
  0xb8   :  { %1800 = vmatprep.mubr.msk.f32.mxu0 %vm374_vm0, %v205_v24  ;;  %1860 = vmatprep.mubr.msk.f32.mxu1 %vm374_vm0, %v325_v25  ;;  %v354_v23 = vld [vmem:[%s3887_s2 + $0x6e0] sm:$0xff]  ;;  %v237_v24 = vld [vmem:[%s3887_s2 + $0x338] sm:$0xff] }
  0xb9   :  { %v357_v25 = vld [vmem:[%s3887_s2 + $0x6f8] sm:$0xff] }
  0xbb   :  { %1010 = vmatmul.mubr.f32.gmra.mrb[70].mxu0 %v204_v26  ;;  %1370 = vmatmul.mubr.f32.gmra.mrb[70].mxu1 %v324_v27  ;;  %v236_v26 = vld [vmem:[%s3887_s2 + $0x330] sm:$0xff] }
  0xbc   :  { %1801 = vmatprep.mubr.msk.f32.mxu0 %vm374_vm0, %v207_v28  ;;  %1861 = vmatprep.mubr.msk.f32.mxu1 %vm374_vm0, %v327_v29  ;;  %v356_v27 = vld [vmem:[%s3887_s2 + $0x6f0] sm:$0xff]  ;;  %v239_v28 = vld [vmem:[%s3887_s2 + $0x348] sm:$0xff] }
  0xbd   :  { %v359_v29 = vld [vmem:[%s3887_s2 + $0x708] sm:$0xff] }
  0xbf   :  { %1016 = vmatmul.mubr.f32.gmra.mrb[72].mxu0 %v206_v30  ;;  %1376 = vmatmul.mubr.f32.gmra.mrb[72].mxu1 %v326_v31  ;;  %v238_v30 = vld [vmem:[%s3887_s2 + $0x340] sm:$0xff] }
  0xc0   :  { %1802 = vmatprep.mubr.msk.f32.mxu0 %vm374_vm0, %v209_v32  ;;  %1862 = vmatprep.mubr.msk.f32.mxu1 %vm374_vm0, %v329_v33  ;;  %v358_v31 = vld [vmem:[%s3887_s2 + $0x700] sm:$0xff]  ;;  %v241_v32 = vld [vmem:[%s3887_s2 + $0x358] sm:$0xff] }
  0xc1   :  { %v361_v33 = vld [vmem:[%s3887_s2 + $0x718] sm:$0xff] }
  0xc3   :  { %1022 = vmatmul.mubr.f32.gmra.mrb[74].mxu0 %v208_v34  ;;  %1382 = vmatmul.mubr.f32.gmra.mrb[74].mxu1 %v328_v35  ;;  %v240_v34 = vld [vmem:[%s3887_s2 + $0x350] sm:$0xff] }
  0xc4   :  { %1803 = vmatprep.mubr.msk.f32.mxu0 %vm374_vm0, %v211_v36  ;;  %1863 = vmatprep.mubr.msk.f32.mxu1 %vm374_vm0, %v331_v37  ;;  %v360_v35 = vld [vmem:[%s3887_s2 + $0x710] sm:$0xff]  ;;  %v243_v36 = vld [vmem:[%s3887_s2 + $0x368] sm:$0xff] }
  0xc5   :  { %v363_v37 = vld [vmem:[%s3887_s2 + $0x728] sm:$0xff] }
  0xc7   :  { %1028 = vmatmul.mubr.f32.gmra.mrb[76].mxu0 %v210_v38  ;;  %1388 = vmatmul.mubr.f32.gmra.mrb[76].mxu1 %v330_v39 }
  0xc8   :  { %1804 = vmatprep.mubr.msk.f32.mxu0 %vm374_vm0, %v213_v40  ;;  %1864 = vmatprep.mubr.msk.f32.mxu1 %vm374_vm0, %v333_v41 }
  0xcb   :  { %1034 = vmatmul.mubr.f32.gmra.mrb[78].mxu0 %v212_v42  ;;  %1394 = vmatmul.mubr.f32.gmra.mrb[78].mxu1 %v332_v43  ;;  %v242_v42 = vld [vmem:[%s3887_s2 + $0x360] sm:$0xff] }
  0xcc   :  { %1805 = vmatprep.mubr.msk.f32.mxu0 %vm374_vm0, %v215_v44  ;;  %1865 = vmatprep.mubr.msk.f32.mxu1 %vm374_vm0, %v335_v45  ;;  %v362_v43 = vld [vmem:[%s3887_s2 + $0x720] sm:$0xff]  ;;  %v245_v44 = vld [vmem:[%s3887_s2 + $0x378] sm:$0xff] }
  0xcd   :  { %v365_v45 = vld [vmem:[%s3887_s2 + $0x738] sm:$0xff] }
  0xcf   :  { %1040 = vmatmul.mubr.f32.gmra.mrb[80].mxu0 %v214_v46  ;;  %1400 = vmatmul.mubr.f32.gmra.mrb[80].mxu1 %v334_v47 }
  0xd0   :  { %1806 = vmatprep.mubr.msk.f32.mxu0 %vm374_vm0, %v217_v48  ;;  %1866 = vmatprep.mubr.msk.f32.mxu1 %vm374_vm0, %v337_v49 }
  0xd3   :  { %1046 = vmatmul.mubr.f32.gmra.mrb[82].mxu0 %v216_v50  ;;  %1406 = vmatmul.mubr.f32.gmra.mrb[82].mxu1 %v336_v51  ;;  %v244_v50 = vld [vmem:[%s3887_s2 + $0x370] sm:$0xff] }
  0xd4   :  { %1807 = vmatprep.mubr.msk.f32.mxu0 %vm374_vm0, %v219_v52  ;;  %1867 = vmatprep.mubr.msk.f32.mxu1 %vm374_vm0, %v339_v53  ;;  %v364_v51 = vld [vmem:[%s3887_s2 + $0x730] sm:$0xff]  ;;  %v247_v52 = vld [vmem:[%s3887_s2 + $0x388] sm:$0xff] }
  0xd5   :  { %v367_v53 = vld [vmem:[%s3887_s2 + $0x748] sm:$0xff] }
  0xd7   :  { %1052 = vmatmul.mubr.f32.gmra.mrb[84].mxu0 %v218_v54  ;;  %1412 = vmatmul.mubr.f32.gmra.mrb[84].mxu1 %v338_v55 }
  0xd8   :  { %1808 = vmatprep.mubr.msk.f32.mxu0 %vm374_vm0, %v221_v56  ;;  %1868 = vmatprep.mubr.msk.f32.mxu1 %vm374_vm0, %v341_v57 }
  0xdb   :  { %1058 = vmatmul.mubr.f32.gmra.mrb[86].mxu0 %v220_v58  ;;  %1418 = vmatmul.mubr.f32.gmra.mrb[86].mxu1 %v340_v59  ;;  %v246_v58 = vld [vmem:[%s3887_s2 + $0x380] sm:$0xff] }
  0xdc   :  { %1809 = vmatprep.mubr.msk.f32.mxu0 %vm374_vm0, %v223_v60  ;;  %1869 = vmatprep.mubr.msk.f32.mxu1 %vm374_vm0, %v343_v61  ;;  %v366_v59 = vld [vmem:[%s3887_s2 + $0x740] sm:$0xff]  ;;  %v249_v60 = vld [vmem:[%s3887_s2 + $0x398] sm:$0xff] }
  0xdd   :  { %v369_v61 = vld [vmem:[%s3887_s2 + $0x758] sm:$0xff] }
  0xdf   :  { %1064 = vmatmul.mubr.f32.gmra.mrb[88].mxu0 %v222_v62  ;;  %1424 = vmatmul.mubr.f32.gmra.mrb[88].mxu1 %v342_v63 }
  0xe0   :  { %1810 = vmatprep.mubr.msk.f32.mxu0 %vm374_vm0, %v225_v0  ;;  %1870 = vmatprep.mubr.msk.f32.mxu1 %vm374_vm0, %v345_v1 }
  0xe3   :  { %1070 = vmatmul.mubr.f32.gmra.mrb[90].mxu0 %v224_v2  ;;  %1430 = vmatmul.mubr.f32.gmra.mrb[90].mxu1 %v344_v3  ;;  %v248_v2 = vld [vmem:[%s3887_s2 + $0x390] sm:$0xff] }
  0xe4   :  { %1811 = vmatprep.mubr.msk.f32.mxu0 %vm374_vm0, %v227_v4  ;;  %1871 = vmatprep.mubr.msk.f32.mxu1 %vm374_vm0, %v347_v5  ;;  %v368_v3 = vld [vmem:[%s3887_s2 + $0x750] sm:$0xff]  ;;  %v251_v4 = vld [vmem:[%s3887_s2 + $0x3a8] sm:$0xff] }
  0xe5   :  { %v371_v5 = vld [vmem:[%s3887_s2 + $0x768] sm:$0xff] }
  0xe7   :  { %1076 = vmatmul.mubr.f32.gmra.mrb[92].mxu0 %v226_v6  ;;  %1436 = vmatmul.mubr.f32.gmra.mrb[92].mxu1 %v346_v7 }
  0xe8   :  { %1812 = vmatprep.mubr.msk.f32.mxu0 %vm374_vm0, %v229_v8  ;;  %1872 = vmatprep.mubr.msk.f32.mxu1 %vm374_vm0, %v349_v9 }
  0xeb   :  { %1082 = vmatmul.mubr.f32.gmra.mrb[94].mxu0 %v228_v10  ;;  %1442 = vmatmul.mubr.f32.gmra.mrb[94].mxu1 %v348_v11  ;;  %v250_v10 = vld [vmem:[%s3887_s2 + $0x3a0] sm:$0xff] }
  0xec   :  { %1813 = vmatprep.mubr.msk.f32.mxu0 %vm374_vm0, %v231_v12  ;;  %1873 = vmatprep.mubr.msk.f32.mxu1 %vm374_vm0, %v351_v13  ;;  %v370_v11 = vld [vmem:[%s3887_s2 + $0x760] sm:$0xff]  ;;  %v253_v12 = vld [vmem:[%s3887_s2 + $0x3b8] sm:$0xff] }
  0xed   :  { %v373_v13 = vld [vmem:[%s3887_s2 + $0x778] sm:$0xff] }
  0xef   :  { %1088 = vmatmul.mubr.f32.gmra.mrb[96].mxu0 %v230_v14  ;;  %1448 = vmatmul.mubr.f32.gmra.mrb[96].mxu1 %v350_v15 }
  0xf0   :  { %1814 = vmatprep.mubr.msk.f32.mxu0 %vm374_vm0, %v233_v16  ;;  %1874 = vmatprep.mubr.msk.f32.mxu1 %vm374_vm0, %v353_v17 }
  0xf3   :  { %1094 = vmatmul.mubr.f32.gmra.mrb[98].mxu0 %v232_v18  ;;  %1454 = vmatmul.mubr.f32.gmra.mrb[98].mxu1 %v352_v19  ;;  %v252_v18 = vld [vmem:[%s3887_s2 + $0x3b0] sm:$0xff] }
  0xf4   :  { %1815 = vmatprep.mubr.msk.f32.mxu0 %vm374_vm0, %v235_v20  ;;  %1875 = vmatprep.mubr.msk.f32.mxu1 %vm374_vm0, %v355_v21  ;;  %v372_v19 = vld [vmem:[%s3887_s2 + $0x770] sm:$0xff] }
  0xf7   :  { %1100 = vmatmul.mubr.f32.gmra.mrb[100].mxu0 %v234_v22  ;;  %1460 = vmatmul.mubr.f32.gmra.mrb[100].mxu1 %v354_v23 }
  0xf8   :  { %1816 = vmatprep.mubr.msk.f32.mxu0 %vm374_vm0, %v237_v24  ;;  %1876 = vmatprep.mubr.msk.f32.mxu1 %vm374_vm0, %v357_v25 }
  0xfb   :  { %1106 = vmatmul.mubr.f32.gmra.mrb[102].mxu0 %v236_v26  ;;  %1466 = vmatmul.mubr.f32.gmra.mrb[102].mxu1 %v356_v27 }
  0xfc   :  { %1817 = vmatprep.mubr.msk.f32.mxu0 %vm374_vm0, %v239_v28  ;;  %1877 = vmatprep.mubr.msk.f32.mxu1 %vm374_vm0, %v359_v29 }
  0xff   :  { %1112 = vmatmul.mubr.f32.gmra.mrb[104].mxu0 %v238_v30  ;;  %1472 = vmatmul.mubr.f32.gmra.mrb[104].mxu1 %v358_v31 }
 0x100   :  { %1818 = vmatprep.mubr.msk.f32.mxu0 %vm374_vm0, %v241_v32  ;;  %1878 = vmatprep.mubr.msk.f32.mxu1 %vm374_vm0, %v361_v33 }
 0x102   :  { %v801_v38 = vpop.f32.mrb[0].mxu0  ;;  %v1161_v39 = vpop.f32.mrb[0].mxu1 }
 0x103   :  { %1520 = vst [vmem:[%s3888_s3] sm:$0xff] %v801_v38  ;;  %1641 = vst [vmem:[%s3888_s3 + $0x3c0] sm:$0xff] %v1161_v39  ;;  %v803_v40 = vpop.f32.mrb[1].mxu0  ;;  %1118 = vmatmul.mubr.f32.gmra.mrb[106].mxu0 %v240_v34  ;;  %v1163_v41 = vpop.f32.mrb[1].mxu1  ;;  %1478 = vmatmul.mubr.f32.gmra.mrb[106].mxu1 %v360_v35 }
 0x104   :  { %1522 = vst.msk [vmem:[%s3888_s3 + $0x8] sm:$0xff] %vm1521_vm1, %v803_v40  ;;  %1642 = vst.msk [vmem:[%s3888_s3 + $0x3c8] sm:$0xff] %vm1521_vm1, %v1163_v41  ;;  %1819 = vmatprep.mubr.msk.f32.mxu0 %vm374_vm0, %v243_v36  ;;  %1879 = vmatprep.mubr.msk.f32.mxu1 %vm374_vm0, %v363_v37 }
 0x106   :  { %v807_v46 = vpop.f32.mrb[2].mxu0  ;;  %v1167_v47 = vpop.f32.mrb[2].mxu1 }
 0x107   :  { %1523 = vst [vmem:[%s3888_s3 + $0x10] sm:$0xff] %v807_v46  ;;  %1643 = vst [vmem:[%s3888_s3 + $0x3d0] sm:$0xff] %v1167_v47  ;;  %v809_v48 = vpop.f32.mrb[3].mxu0  ;;  %1124 = vmatmul.mubr.f32.gmra.mrb[108].mxu0 %v242_v42  ;;  %v1169_v49 = vpop.f32.mrb[3].mxu1  ;;  %1484 = vmatmul.mubr.f32.gmra.mrb[108].mxu1 %v362_v43 }
 0x108   :  { %1524 = vst.msk [vmem:[%s3888_s3 + $0x18] sm:$0xff] %vm1521_vm1, %v809_v48  ;;  %1644 = vst.msk [vmem:[%s3888_s3 + $0x3d8] sm:$0xff] %vm1521_vm1, %v1169_v49  ;;  %1820 = vmatprep.mubr.msk.f32.mxu0 %vm374_vm0, %v245_v44  ;;  %1880 = vmatprep.mubr.msk.f32.mxu1 %vm374_vm0, %v365_v45 }
 0x10a   :  { %v813_v54 = vpop.f32.mrb[4].mxu0  ;;  %v1173_v55 = vpop.f32.mrb[4].mxu1 }
 0x10b   :  { %1525 = vst [vmem:[%s3888_s3 + $0x20] sm:$0xff] %v813_v54  ;;  %1645 = vst [vmem:[%s3888_s3 + $0x3e0] sm:$0xff] %v1173_v55  ;;  %v815_v56 = vpop.f32.mrb[5].mxu0  ;;  %1130 = vmatmul.mubr.f32.gmra.mrb[110].mxu0 %v244_v50  ;;  %v1175_v57 = vpop.f32.mrb[5].mxu1  ;;  %1490 = vmatmul.mubr.f32.gmra.mrb[110].mxu1 %v364_v51 }
 0x10c   :  { %1526 = vst.msk [vmem:[%s3888_s3 + $0x28] sm:$0xff] %vm1521_vm1, %v815_v56  ;;  %1646 = vst.msk [vmem:[%s3888_s3 + $0x3e8] sm:$0xff] %vm1521_vm1, %v1175_v57  ;;  %1821 = vmatprep.mubr.msk.f32.mxu0 %vm374_vm0, %v247_v52  ;;  %1881 = vmatprep.mubr.msk.f32.mxu1 %vm374_vm0, %v367_v53 }
 0x10e   :  { %v819_v62 = vpop.f32.mrb[6].mxu0  ;;  %v1179_v63 = vpop.f32.mrb[6].mxu1 }
 0x10f   :  { %1527 = vst [vmem:[%s3888_s3 + $0x30] sm:$0xff] %v819_v62  ;;  %1647 = vst [vmem:[%s3888_s3 + $0x3f0] sm:$0xff] %v1179_v63  ;;  %v821_v0 = vpop.f32.mrb[7].mxu0  ;;  %1136 = vmatmul.mubr.f32.gmra.mrb[112].mxu0 %v246_v58  ;;  %v1181_v1 = vpop.f32.mrb[7].mxu1  ;;  %1496 = vmatmul.mubr.f32.gmra.mrb[112].mxu1 %v366_v59 }
 0x110   :  { %1528 = vst.msk [vmem:[%s3888_s3 + $0x38] sm:$0xff] %vm1521_vm1, %v821_v0  ;;  %1648 = vst.msk [vmem:[%s3888_s3 + $0x3f8] sm:$0xff] %vm1521_vm1, %v1181_v1  ;;  %1822 = vmatprep.mubr.msk.f32.mxu0 %vm374_vm0, %v249_v60  ;;  %1882 = vmatprep.mubr.msk.f32.mxu1 %vm374_vm0, %v369_v61 }
 0x112   :  { %v825_v6 = vpop.f32.mrb[8].mxu0  ;;  %v1185_v7 = vpop.f32.mrb[8].mxu1 }
 0x113   :  { %1529 = vst [vmem:[%s3888_s3 + $0x40] sm:$0xff] %v825_v6  ;;  %1649 = vst [vmem:[%s3888_s3 + $0x400] sm:$0xff] %v1185_v7  ;;  %v827_v8 = vpop.f32.mrb[9].mxu0  ;;  %1142 = vmatmul.mubr.f32.gmra.mrb[114].mxu0 %v248_v2  ;;  %v1187_v9 = vpop.f32.mrb[9].mxu1  ;;  %1502 = vmatmul.mubr.f32.gmra.mrb[114].mxu1 %v368_v3 }
 0x114   :  { %1530 = vst.msk [vmem:[%s3888_s3 + $0x48] sm:$0xff] %vm1521_vm1, %v827_v8  ;;  %1650 = vst.msk [vmem:[%s3888_s3 + $0x408] sm:$0xff] %vm1521_vm1, %v1187_v9  ;;  %1823 = vmatprep.mubr.msk.f32.mxu0 %vm374_vm0, %v251_v4  ;;  %1883 = vmatprep.mubr.msk.f32.mxu1 %vm374_vm0, %v371_v5 }
 0x116   :  { %v831_v14 = vpop.f32.mrb[10].mxu0  ;;  %v1191_v15 = vpop.f32.mrb[10].mxu1 }
 0x117   :  { %1531 = vst [vmem:[%s3888_s3 + $0x50] sm:$0xff] %v831_v14  ;;  %1651 = vst [vmem:[%s3888_s3 + $0x410] sm:$0xff] %v1191_v15  ;;  %v833_v16 = vpop.f32.mrb[11].mxu0  ;;  %1148 = vmatmul.mubr.f32.gmra.mrb[116].mxu0 %v250_v10  ;;  %v1193_v17 = vpop.f32.mrb[11].mxu1  ;;  %1508 = vmatmul.mubr.f32.gmra.mrb[116].mxu1 %v370_v11 }
 0x118   :  { %1532 = vst.msk [vmem:[%s3888_s3 + $0x58] sm:$0xff] %vm1521_vm1, %v833_v16  ;;  %1652 = vst.msk [vmem:[%s3888_s3 + $0x418] sm:$0xff] %vm1521_vm1, %v1193_v17  ;;  %1824 = vmatprep.mubr.msk.f32.mxu0 %vm374_vm0, %v253_v12  ;;  %1884 = vmatprep.mubr.msk.f32.mxu1 %vm374_vm0, %v373_v13 }
 0x11a   :  { %v837_v20 = vpop.f32.mrb[12].mxu0  ;;  %v1197_v21 = vpop.f32.mrb[12].mxu1 }
 0x11b   :  { %1533 = vst [vmem:[%s3888_s3 + $0x60] sm:$0xff] %v837_v20  ;;  %1653 = vst [vmem:[%s3888_s3 + $0x420] sm:$0xff] %v1197_v21  ;;  %v839_v22 = vpop.f32.mrb[13].mxu0  ;;  %1154 = vmatmul.mubr.f32.gmra.mrb[118].mxu0 %v252_v18  ;;  %v1199_v23 = vpop.f32.mrb[13].mxu1  ;;  %1514 = vmatmul.mubr.f32.gmra.mrb[118].mxu1 %v372_v19 }
 0x11c   :  { %1534 = vst.msk [vmem:[%s3888_s3 + $0x68] sm:$0xff] %vm1521_vm1, %v839_v22  ;;  %1654 = vst.msk [vmem:[%s3888_s3 + $0x428] sm:$0xff] %vm1521_vm1, %v1199_v23 }
 0x11e   :  { %v843_v24 = vpop.f32.mrb[14].mxu0  ;;  %v1203_v25 = vpop.f32.mrb[14].mxu1 }
 0x11f   :  { %1535 = vst [vmem:[%s3888_s3 + $0x70] sm:$0xff] %v843_v24  ;;  %1655 = vst [vmem:[%s3888_s3 + $0x430] sm:$0xff] %v1203_v25  ;;  %v845_v26 = vpop.f32.mrb[15].mxu0  ;;  %v1205_v27 = vpop.f32.mrb[15].mxu1 }
 0x120   :  { %1536 = vst.msk [vmem:[%s3888_s3 + $0x78] sm:$0xff] %vm1521_vm1, %v845_v26  ;;  %1656 = vst.msk [vmem:[%s3888_s3 + $0x438] sm:$0xff] %vm1521_vm1, %v1205_v27 }
 0x122   :  { %v849_v28 = vpop.f32.mrb[16].mxu0  ;;  %v1209_v29 = vpop.f32.mrb[16].mxu1 }
 0x123   :  { %1537 = vst [vmem:[%s3888_s3 + $0x80] sm:$0xff] %v849_v28  ;;  %1657 = vst [vmem:[%s3888_s3 + $0x440] sm:$0xff] %v1209_v29  ;;  %v851_v30 = vpop.f32.mrb[17].mxu0  ;;  %v1211_v31 = vpop.f32.mrb[17].mxu1 }
 0x124   :  { %1538 = vst.msk [vmem:[%s3888_s3 + $0x88] sm:$0xff] %vm1521_vm1, %v851_v30  ;;  %1658 = vst.msk [vmem:[%s3888_s3 + $0x448] sm:$0xff] %vm1521_vm1, %v1211_v31 }
 0x126   :  { %v855_v32 = vpop.f32.mrb[18].mxu0  ;;  %v1215_v33 = vpop.f32.mrb[18].mxu1 }
 0x127   :  { %1539 = vst [vmem:[%s3888_s3 + $0x90] sm:$0xff] %v855_v32  ;;  %1659 = vst [vmem:[%s3888_s3 + $0x450] sm:$0xff] %v1215_v33  ;;  %v857_v34 = vpop.f32.mrb[19].mxu0  ;;  %v1217_v35 = vpop.f32.mrb[19].mxu1 }
 0x128   :  { %1540 = vst.msk [vmem:[%s3888_s3 + $0x98] sm:$0xff] %vm1521_vm1, %v857_v34  ;;  %1660 = vst.msk [vmem:[%s3888_s3 + $0x458] sm:$0xff] %vm1521_vm1, %v1217_v35 }
 0x12a   :  { %v861_v36 = vpop.f32.mrb[20].mxu0  ;;  %v1221_v37 = vpop.f32.mrb[20].mxu1 }
 0x12b   :  { %1541 = vst [vmem:[%s3888_s3 + $0xa0] sm:$0xff] %v861_v36  ;;  %1661 = vst [vmem:[%s3888_s3 + $0x460] sm:$0xff] %v1221_v37  ;;  %v863_v38 = vpop.f32.mrb[21].mxu0  ;;  %v1223_v39 = vpop.f32.mrb[21].mxu1 }
 0x12c   :  { %1542 = vst.msk [vmem:[%s3888_s3 + $0xa8] sm:$0xff] %vm1521_vm1, %v863_v38  ;;  %1662 = vst.msk [vmem:[%s3888_s3 + $0x468] sm:$0xff] %vm1521_vm1, %v1223_v39 }
 0x12e   :  { %v867_v40 = vpop.f32.mrb[22].mxu0  ;;  %v1227_v41 = vpop.f32.mrb[22].mxu1 }
 0x12f   :  { %1543 = vst [vmem:[%s3888_s3 + $0xb0] sm:$0xff] %v867_v40  ;;  %1663 = vst [vmem:[%s3888_s3 + $0x470] sm:$0xff] %v1227_v41  ;;  %v869_v42 = vpop.f32.mrb[23].mxu0  ;;  %v1229_v43 = vpop.f32.mrb[23].mxu1 }
 0x130   :  { %1544 = vst.msk [vmem:[%s3888_s3 + $0xb8] sm:$0xff] %vm1521_vm1, %v869_v42  ;;  %1664 = vst.msk [vmem:[%s3888_s3 + $0x478] sm:$0xff] %vm1521_vm1, %v1229_v43 }
 0x132   :  { %v873_v44 = vpop.f32.mrb[24].mxu0  ;;  %v1233_v45 = vpop.f32.mrb[24].mxu1 }
 0x133   :  { %1545 = vst [vmem:[%s3888_s3 + $0xc0] sm:$0xff] %v873_v44  ;;  %1665 = vst [vmem:[%s3888_s3 + $0x480] sm:$0xff] %v1233_v45  ;;  %v875_v46 = vpop.f32.mrb[25].mxu0  ;;  %v1235_v47 = vpop.f32.mrb[25].mxu1 }
 0x134   :  { %1546 = vst.msk [vmem:[%s3888_s3 + $0xc8] sm:$0xff] %vm1521_vm1, %v875_v46  ;;  %1666 = vst.msk [vmem:[%s3888_s3 + $0x488] sm:$0xff] %vm1521_vm1, %v1235_v47 }
 0x136   :  { %v879_v48 = vpop.f32.mrb[26].mxu0  ;;  %v1239_v49 = vpop.f32.mrb[26].mxu1 }
 0x137   :  { %1547 = vst [vmem:[%s3888_s3 + $0xd0] sm:$0xff] %v879_v48  ;;  %1667 = vst [vmem:[%s3888_s3 + $0x490] sm:$0xff] %v1239_v49  ;;  %v881_v50 = vpop.f32.mrb[27].mxu0  ;;  %v1241_v51 = vpop.f32.mrb[27].mxu1 }
 0x138   :  { %1548 = vst.msk [vmem:[%s3888_s3 + $0xd8] sm:$0xff] %vm1521_vm1, %v881_v50  ;;  %1668 = vst.msk [vmem:[%s3888_s3 + $0x498] sm:$0xff] %vm1521_vm1, %v1241_v51 }
 0x13a   :  { %v885_v52 = vpop.f32.mrb[28].mxu0  ;;  %v1245_v53 = vpop.f32.mrb[28].mxu1 }
 0x13b   :  { %1549 = vst [vmem:[%s3888_s3 + $0xe0] sm:$0xff] %v885_v52  ;;  %1669 = vst [vmem:[%s3888_s3 + $0x4a0] sm:$0xff] %v1245_v53  ;;  %v887_v54 = vpop.f32.mrb[29].mxu0  ;;  %v1247_v55 = vpop.f32.mrb[29].mxu1 }
 0x13c   :  { %1550 = vst.msk [vmem:[%s3888_s3 + $0xe8] sm:$0xff] %vm1521_vm1, %v887_v54  ;;  %1670 = vst.msk [vmem:[%s3888_s3 + $0x4a8] sm:$0xff] %vm1521_vm1, %v1247_v55 }
 0x13e   :  { %v891_v56 = vpop.f32.mrb[30].mxu0  ;;  %v1251_v57 = vpop.f32.mrb[30].mxu1 }
 0x13f   :  { %1551 = vst [vmem:[%s3888_s3 + $0xf0] sm:$0xff] %v891_v56  ;;  %1671 = vst [vmem:[%s3888_s3 + $0x4b0] sm:$0xff] %v1251_v57  ;;  %v893_v58 = vpop.f32.mrb[31].mxu0  ;;  %v1253_v59 = vpop.f32.mrb[31].mxu1 }
 0x140   :  { %1552 = vst.msk [vmem:[%s3888_s3 + $0xf8] sm:$0xff] %vm1521_vm1, %v893_v58  ;;  %1672 = vst.msk [vmem:[%s3888_s3 + $0x4b8] sm:$0xff] %vm1521_vm1, %v1253_v59 }
 0x142   :  { %v897_v60 = vpop.f32.mrb[32].mxu0  ;;  %v1257_v61 = vpop.f32.mrb[32].mxu1 }
 0x143   :  { %1553 = vst [vmem:[%s3888_s3 + $0x100] sm:$0xff] %v897_v60  ;;  %1673 = vst [vmem:[%s3888_s3 + $0x4c0] sm:$0xff] %v1257_v61  ;;  %v899_v62 = vpop.f32.mrb[33].mxu0  ;;  %v1259_v63 = vpop.f32.mrb[33].mxu1 }
 0x144   :  { %1554 = vst.msk [vmem:[%s3888_s3 + $0x108] sm:$0xff] %vm1521_vm1, %v899_v62  ;;  %1674 = vst.msk [vmem:[%s3888_s3 + $0x4c8] sm:$0xff] %vm1521_vm1, %v1259_v63 }
 0x146   :  { %v903_v0 = vpop.f32.mrb[34].mxu0  ;;  %v1263_v1 = vpop.f32.mrb[34].mxu1 }
 0x147   :  { %1555 = vst [vmem:[%s3888_s3 + $0x110] sm:$0xff] %v903_v0  ;;  %1675 = vst [vmem:[%s3888_s3 + $0x4d0] sm:$0xff] %v1263_v1  ;;  %v905_v2 = vpop.f32.mrb[35].mxu0  ;;  %v1265_v3 = vpop.f32.mrb[35].mxu1 }
 0x148   :  { %1556 = vst.msk [vmem:[%s3888_s3 + $0x118] sm:$0xff] %vm1521_vm1, %v905_v2  ;;  %1676 = vst.msk [vmem:[%s3888_s3 + $0x4d8] sm:$0xff] %vm1521_vm1, %v1265_v3 }
 0x14a   :  { %v909_v4 = vpop.f32.mrb[36].mxu0  ;;  %v1269_v5 = vpop.f32.mrb[36].mxu1 }
 0x14b   :  { %1557 = vst [vmem:[%s3888_s3 + $0x120] sm:$0xff] %v909_v4  ;;  %1677 = vst [vmem:[%s3888_s3 + $0x4e0] sm:$0xff] %v1269_v5  ;;  %v911_v6 = vpop.f32.mrb[37].mxu0  ;;  %v1271_v7 = vpop.f32.mrb[37].mxu1 }
 0x14c   :  { %1558 = vst.msk [vmem:[%s3888_s3 + $0x128] sm:$0xff] %vm1521_vm1, %v911_v6  ;;  %1678 = vst.msk [vmem:[%s3888_s3 + $0x4e8] sm:$0xff] %vm1521_vm1, %v1271_v7 }
 0x14e   :  { %v915_v8 = vpop.f32.mrb[38].mxu0  ;;  %v1275_v9 = vpop.f32.mrb[38].mxu1 }
 0x14f   :  { %1559 = vst [vmem:[%s3888_s3 + $0x130] sm:$0xff] %v915_v8  ;;  %1679 = vst [vmem:[%s3888_s3 + $0x4f0] sm:$0xff] %v1275_v9  ;;  %v917_v10 = vpop.f32.mrb[39].mxu0  ;;  %v1277_v11 = vpop.f32.mrb[39].mxu1 }
 0x150   :  { %1560 = vst.msk [vmem:[%s3888_s3 + $0x138] sm:$0xff] %vm1521_vm1, %v917_v10  ;;  %1680 = vst.msk [vmem:[%s3888_s3 + $0x4f8] sm:$0xff] %vm1521_vm1, %v1277_v11 }
 0x152   :  { %v921_v12 = vpop.f32.mrb[40].mxu0  ;;  %v1281_v13 = vpop.f32.mrb[40].mxu1 }
 0x153   :  { %1561 = vst [vmem:[%s3888_s3 + $0x140] sm:$0xff] %v921_v12  ;;  %1681 = vst [vmem:[%s3888_s3 + $0x500] sm:$0xff] %v1281_v13  ;;  %v923_v14 = vpop.f32.mrb[41].mxu0  ;;  %v1283_v15 = vpop.f32.mrb[41].mxu1 }
 0x154   :  { %1562 = vst.msk [vmem:[%s3888_s3 + $0x148] sm:$0xff] %vm1521_vm1, %v923_v14  ;;  %1682 = vst.msk [vmem:[%s3888_s3 + $0x508] sm:$0xff] %vm1521_vm1, %v1283_v15 }
 0x156   :  { %v927_v16 = vpop.f32.mrb[42].mxu0  ;;  %v1287_v17 = vpop.f32.mrb[42].mxu1 }
 0x157   :  { %1563 = vst [vmem:[%s3888_s3 + $0x150] sm:$0xff] %v927_v16  ;;  %1683 = vst [vmem:[%s3888_s3 + $0x510] sm:$0xff] %v1287_v17  ;;  %v929_v18 = vpop.f32.mrb[43].mxu0  ;;  %v1289_v19 = vpop.f32.mrb[43].mxu1 }
 0x158   :  { %1564 = vst.msk [vmem:[%s3888_s3 + $0x158] sm:$0xff] %vm1521_vm1, %v929_v18  ;;  %1684 = vst.msk [vmem:[%s3888_s3 + $0x518] sm:$0xff] %vm1521_vm1, %v1289_v19 }
 0x15a   :  { %v933_v20 = vpop.f32.mrb[44].mxu0  ;;  %v1293_v21 = vpop.f32.mrb[44].mxu1 }
 0x15b   :  { %1565 = vst [vmem:[%s3888_s3 + $0x160] sm:$0xff] %v933_v20  ;;  %1685 = vst [vmem:[%s3888_s3 + $0x520] sm:$0xff] %v1293_v21  ;;  %v935_v22 = vpop.f32.mrb[45].mxu0  ;;  %v1295_v23 = vpop.f32.mrb[45].mxu1 }
 0x15c   :  { %1566 = vst.msk [vmem:[%s3888_s3 + $0x168] sm:$0xff] %vm1521_vm1, %v935_v22  ;;  %1686 = vst.msk [vmem:[%s3888_s3 + $0x528] sm:$0xff] %vm1521_vm1, %v1295_v23 }
 0x15e   :  { %v939_v24 = vpop.f32.mrb[46].mxu0  ;;  %v1299_v25 = vpop.f32.mrb[46].mxu1 }
 0x15f   :  { %1567 = vst [vmem:[%s3888_s3 + $0x170] sm:$0xff] %v939_v24  ;;  %1687 = vst [vmem:[%s3888_s3 + $0x530] sm:$0xff] %v1299_v25  ;;  %v941_v26 = vpop.f32.mrb[47].mxu0  ;;  %v1301_v27 = vpop.f32.mrb[47].mxu1 }
 0x160   :  { %1568 = vst.msk [vmem:[%s3888_s3 + $0x178] sm:$0xff] %vm1521_vm1, %v941_v26  ;;  %1688 = vst.msk [vmem:[%s3888_s3 + $0x538] sm:$0xff] %vm1521_vm1, %v1301_v27 }
 0x162   :  { %v945_v28 = vpop.f32.mrb[48].mxu0  ;;  %v1305_v29 = vpop.f32.mrb[48].mxu1 }
 0x163   :  { %1569 = vst [vmem:[%s3888_s3 + $0x180] sm:$0xff] %v945_v28  ;;  %1689 = vst [vmem:[%s3888_s3 + $0x540] sm:$0xff] %v1305_v29  ;;  %v947_v30 = vpop.f32.mrb[49].mxu0  ;;  %v1307_v31 = vpop.f32.mrb[49].mxu1 }
 0x164   :  { %1570 = vst.msk [vmem:[%s3888_s3 + $0x188] sm:$0xff] %vm1521_vm1, %v947_v30  ;;  %1690 = vst.msk [vmem:[%s3888_s3 + $0x548] sm:$0xff] %vm1521_vm1, %v1307_v31 }
 0x166   :  { %v951_v32 = vpop.f32.mrb[50].mxu0  ;;  %v1311_v33 = vpop.f32.mrb[50].mxu1 }
 0x167   :  { %1571 = vst [vmem:[%s3888_s3 + $0x190] sm:$0xff] %v951_v32  ;;  %1691 = vst [vmem:[%s3888_s3 + $0x550] sm:$0xff] %v1311_v33  ;;  %v953_v34 = vpop.f32.mrb[51].mxu0  ;;  %v1313_v35 = vpop.f32.mrb[51].mxu1 }
 0x168   :  { %1572 = vst.msk [vmem:[%s3888_s3 + $0x198] sm:$0xff] %vm1521_vm1, %v953_v34  ;;  %1692 = vst.msk [vmem:[%s3888_s3 + $0x558] sm:$0xff] %vm1521_vm1, %v1313_v35 }
 0x16a   :  { %v957_v36 = vpop.f32.mrb[52].mxu0  ;;  %v1317_v37 = vpop.f32.mrb[52].mxu1 }
 0x16b   :  { %1573 = vst [vmem:[%s3888_s3 + $0x1a0] sm:$0xff] %v957_v36  ;;  %1693 = vst [vmem:[%s3888_s3 + $0x560] sm:$0xff] %v1317_v37  ;;  %v959_v38 = vpop.f32.mrb[53].mxu0  ;;  %v1319_v39 = vpop.f32.mrb[53].mxu1 }
 0x16c   :  { %1574 = vst.msk [vmem:[%s3888_s3 + $0x1a8] sm:$0xff] %vm1521_vm1, %v959_v38  ;;  %1694 = vst.msk [vmem:[%s3888_s3 + $0x568] sm:$0xff] %vm1521_vm1, %v1319_v39 }
 0x16e   :  { %v963_v40 = vpop.f32.mrb[54].mxu0  ;;  %v1323_v41 = vpop.f32.mrb[54].mxu1 }
 0x16f   :  { %1575 = vst [vmem:[%s3888_s3 + $0x1b0] sm:$0xff] %v963_v40  ;;  %1695 = vst [vmem:[%s3888_s3 + $0x570] sm:$0xff] %v1323_v41  ;;  %v965_v42 = vpop.f32.mrb[55].mxu0  ;;  %v1325_v43 = vpop.f32.mrb[55].mxu1 }
 0x170   :  { %1576 = vst.msk [vmem:[%s3888_s3 + $0x1b8] sm:$0xff] %vm1521_vm1, %v965_v42  ;;  %1696 = vst.msk [vmem:[%s3888_s3 + $0x578] sm:$0xff] %vm1521_vm1, %v1325_v43 }
 0x172   :  { %v969_v44 = vpop.f32.mrb[56].mxu0  ;;  %v1329_v45 = vpop.f32.mrb[56].mxu1 }
 0x173   :  { %1577 = vst [vmem:[%s3888_s3 + $0x1c0] sm:$0xff] %v969_v44  ;;  %1697 = vst [vmem:[%s3888_s3 + $0x580] sm:$0xff] %v1329_v45  ;;  %v971_v46 = vpop.f32.mrb[57].mxu0  ;;  %v1331_v47 = vpop.f32.mrb[57].mxu1 }
 0x174   :  { %1578 = vst.msk [vmem:[%s3888_s3 + $0x1c8] sm:$0xff] %vm1521_vm1, %v971_v46  ;;  %1698 = vst.msk [vmem:[%s3888_s3 + $0x588] sm:$0xff] %vm1521_vm1, %v1331_v47 }
 0x176   :  { %v975_v48 = vpop.f32.mrb[58].mxu0  ;;  %v1335_v49 = vpop.f32.mrb[58].mxu1 }
 0x177   :  { %1579 = vst [vmem:[%s3888_s3 + $0x1d0] sm:$0xff] %v975_v48  ;;  %1699 = vst [vmem:[%s3888_s3 + $0x590] sm:$0xff] %v1335_v49  ;;  %v977_v50 = vpop.f32.mrb[59].mxu0  ;;  %v1337_v51 = vpop.f32.mrb[59].mxu1 }
 0x178   :  { %1580 = vst.msk [vmem:[%s3888_s3 + $0x1d8] sm:$0xff] %vm1521_vm1, %v977_v50  ;;  %1700 = vst.msk [vmem:[%s3888_s3 + $0x598] sm:$0xff] %vm1521_vm1, %v1337_v51 }
 0x17a   :  { %v981_v52 = vpop.f32.mrb[60].mxu0  ;;  %v1341_v53 = vpop.f32.mrb[60].mxu1 }
 0x17b   :  { %1581 = vst [vmem:[%s3888_s3 + $0x1e0] sm:$0xff] %v981_v52  ;;  %1701 = vst [vmem:[%s3888_s3 + $0x5a0] sm:$0xff] %v1341_v53  ;;  %v983_v54 = vpop.f32.mrb[61].mxu0  ;;  %v1343_v55 = vpop.f32.mrb[61].mxu1 }
 0x17c   :  { %1582 = vst.msk [vmem:[%s3888_s3 + $0x1e8] sm:$0xff] %vm1521_vm1, %v983_v54  ;;  %1702 = vst.msk [vmem:[%s3888_s3 + $0x5a8] sm:$0xff] %vm1521_vm1, %v1343_v55 }
 0x17e   :  { %v987_v56 = vpop.f32.mrb[62].mxu0  ;;  %v1347_v57 = vpop.f32.mrb[62].mxu1 }
 0x17f   :  { %1583 = vst [vmem:[%s3888_s3 + $0x1f0] sm:$0xff] %v987_v56  ;;  %1703 = vst [vmem:[%s3888_s3 + $0x5b0] sm:$0xff] %v1347_v57  ;;  %v989_v58 = vpop.f32.mrb[63].mxu0  ;;  %v1349_v59 = vpop.f32.mrb[63].mxu1 }
 0x180   :  { %1584 = vst.msk [vmem:[%s3888_s3 + $0x1f8] sm:$0xff] %vm1521_vm1, %v989_v58  ;;  %1704 = vst.msk [vmem:[%s3888_s3 + $0x5b8] sm:$0xff] %vm1521_vm1, %v1349_v59 }
 0x182   :  { %v993_v60 = vpop.f32.mrb[64].mxu0  ;;  %v1353_v61 = vpop.f32.mrb[64].mxu1 }
 0x183   :  { %1585 = vst [vmem:[%s3888_s3 + $0x200] sm:$0xff] %v993_v60  ;;  %1705 = vst [vmem:[%s3888_s3 + $0x5c0] sm:$0xff] %v1353_v61  ;;  %v995_v62 = vpop.f32.mrb[65].mxu0  ;;  %v1355_v63 = vpop.f32.mrb[65].mxu1 }
 0x184   :  { %1586 = vst.msk [vmem:[%s3888_s3 + $0x208] sm:$0xff] %vm1521_vm1, %v995_v62  ;;  %1706 = vst.msk [vmem:[%s3888_s3 + $0x5c8] sm:$0xff] %vm1521_vm1, %v1355_v63 }
 0x186   :  { %v999_v0 = vpop.f32.mrb[66].mxu0  ;;  %v1359_v1 = vpop.f32.mrb[66].mxu1 }
 0x187   :  { %1587 = vst [vmem:[%s3888_s3 + $0x210] sm:$0xff] %v999_v0  ;;  %1707 = vst [vmem:[%s3888_s3 + $0x5d0] sm:$0xff] %v1359_v1  ;;  %v1001_v2 = vpop.f32.mrb[67].mxu0  ;;  %v1361_v3 = vpop.f32.mrb[67].mxu1 }
 0x188   :  { %1588 = vst.msk [vmem:[%s3888_s3 + $0x218] sm:$0xff] %vm1521_vm1, %v1001_v2  ;;  %1708 = vst.msk [vmem:[%s3888_s3 + $0x5d8] sm:$0xff] %vm1521_vm1, %v1361_v3 }
 0x18a   :  { %v1005_v4 = vpop.f32.mrb[68].mxu0  ;;  %v1365_v5 = vpop.f32.mrb[68].mxu1 }
 0x18b   :  { %1589 = vst [vmem:[%s3888_s3 + $0x220] sm:$0xff] %v1005_v4  ;;  %1709 = vst [vmem:[%s3888_s3 + $0x5e0] sm:$0xff] %v1365_v5  ;;  %v1007_v6 = vpop.f32.mrb[69].mxu0  ;;  %v1367_v7 = vpop.f32.mrb[69].mxu1 }
 0x18c   :  { %1590 = vst.msk [vmem:[%s3888_s3 + $0x228] sm:$0xff] %vm1521_vm1, %v1007_v6  ;;  %1710 = vst.msk [vmem:[%s3888_s3 + $0x5e8] sm:$0xff] %vm1521_vm1, %v1367_v7 }
 0x18e   :  { %v1011_v8 = vpop.f32.mrb[70].mxu0  ;;  %v1371_v9 = vpop.f32.mrb[70].mxu1 }
 0x18f   :  { %1591 = vst [vmem:[%s3888_s3 + $0x230] sm:$0xff] %v1011_v8  ;;  %1711 = vst [vmem:[%s3888_s3 + $0x5f0] sm:$0xff] %v1371_v9  ;;  %v1013_v10 = vpop.f32.mrb[71].mxu0  ;;  %v1373_v11 = vpop.f32.mrb[71].mxu1 }
 0x190   :  { %1592 = vst.msk [vmem:[%s3888_s3 + $0x238] sm:$0xff] %vm1521_vm1, %v1013_v10  ;;  %1712 = vst.msk [vmem:[%s3888_s3 + $0x5f8] sm:$0xff] %vm1521_vm1, %v1373_v11 }
 0x192   :  { %v1017_v12 = vpop.f32.mrb[72].mxu0  ;;  %v1377_v13 = vpop.f32.mrb[72].mxu1 }
 0x193   :  { %1593 = vst [vmem:[%s3888_s3 + $0x240] sm:$0xff] %v1017_v12  ;;  %1713 = vst [vmem:[%s3888_s3 + $0x600] sm:$0xff] %v1377_v13  ;;  %v1019_v14 = vpop.f32.mrb[73].mxu0  ;;  %v1379_v15 = vpop.f32.mrb[73].mxu1 }
 0x194   :  { %1594 = vst.msk [vmem:[%s3888_s3 + $0x248] sm:$0xff] %vm1521_vm1, %v1019_v14  ;;  %1714 = vst.msk [vmem:[%s3888_s3 + $0x608] sm:$0xff] %vm1521_vm1, %v1379_v15 }
 0x196   :  { %v1023_v16 = vpop.f32.mrb[74].mxu0  ;;  %v1383_v17 = vpop.f32.mrb[74].mxu1 }
 0x197   :  { %1595 = vst [vmem:[%s3888_s3 + $0x250] sm:$0xff] %v1023_v16  ;;  %1715 = vst [vmem:[%s3888_s3 + $0x610] sm:$0xff] %v1383_v17  ;;  %v1025_v18 = vpop.f32.mrb[75].mxu0  ;;  %v1385_v19 = vpop.f32.mrb[75].mxu1 }
 0x198   :  { %1596 = vst.msk [vmem:[%s3888_s3 + $0x258] sm:$0xff] %vm1521_vm1, %v1025_v18  ;;  %1716 = vst.msk [vmem:[%s3888_s3 + $0x618] sm:$0xff] %vm1521_vm1, %v1385_v19 }
 0x19a   :  { %v1029_v20 = vpop.f32.mrb[76].mxu0  ;;  %v1389_v21 = vpop.f32.mrb[76].mxu1 }
 0x19b   :  { %1597 = vst [vmem:[%s3888_s3 + $0x260] sm:$0xff] %v1029_v20  ;;  %1717 = vst [vmem:[%s3888_s3 + $0x620] sm:$0xff] %v1389_v21  ;;  %v1031_v22 = vpop.f32.mrb[77].mxu0  ;;  %v1391_v23 = vpop.f32.mrb[77].mxu1 }
 0x19c   :  { %1598 = vst.msk [vmem:[%s3888_s3 + $0x268] sm:$0xff] %vm1521_vm1, %v1031_v22  ;;  %1718 = vst.msk [vmem:[%s3888_s3 + $0x628] sm:$0xff] %vm1521_vm1, %v1391_v23 }
 0x19e   :  { %v1035_v24 = vpop.f32.mrb[78].mxu0  ;;  %v1395_v25 = vpop.f32.mrb[78].mxu1 }
 0x19f   :  { %1599 = vst [vmem:[%s3888_s3 + $0x270] sm:$0xff] %v1035_v24  ;;  %1719 = vst [vmem:[%s3888_s3 + $0x630] sm:$0xff] %v1395_v25  ;;  %v1037_v26 = vpop.f32.mrb[79].mxu0  ;;  %v1397_v27 = vpop.f32.mrb[79].mxu1 }
 0x1a0   :  { %1600 = vst.msk [vmem:[%s3888_s3 + $0x278] sm:$0xff] %vm1521_vm1, %v1037_v26  ;;  %1720 = vst.msk [vmem:[%s3888_s3 + $0x638] sm:$0xff] %vm1521_vm1, %v1397_v27 }
 0x1a2   :  { %v1041_v28 = vpop.f32.mrb[80].mxu0  ;;  %v1401_v29 = vpop.f32.mrb[80].mxu1 }
 0x1a3   :  { %1601 = vst [vmem:[%s3888_s3 + $0x280] sm:$0xff] %v1041_v28  ;;  %1721 = vst [vmem:[%s3888_s3 + $0x640] sm:$0xff] %v1401_v29  ;;  %v1043_v30 = vpop.f32.mrb[81].mxu0  ;;  %v1403_v31 = vpop.f32.mrb[81].mxu1 }
 0x1a4   :  { %1602 = vst.msk [vmem:[%s3888_s3 + $0x288] sm:$0xff] %vm1521_vm1, %v1043_v30  ;;  %1722 = vst.msk [vmem:[%s3888_s3 + $0x648] sm:$0xff] %vm1521_vm1, %v1403_v31 }
 0x1a6   :  { %v1047_v32 = vpop.f32.mrb[82].mxu0  ;;  %v1407_v33 = vpop.f32.mrb[82].mxu1 }
 0x1a7   :  { %1603 = vst [vmem:[%s3888_s3 + $0x290] sm:$0xff] %v1047_v32  ;;  %1723 = vst [vmem:[%s3888_s3 + $0x650] sm:$0xff] %v1407_v33  ;;  %v1049_v34 = vpop.f32.mrb[83].mxu0  ;;  %v1409_v35 = vpop.f32.mrb[83].mxu1 }
 0x1a8   :  { %1604 = vst.msk [vmem:[%s3888_s3 + $0x298] sm:$0xff] %vm1521_vm1, %v1049_v34  ;;  %1724 = vst.msk [vmem:[%s3888_s3 + $0x658] sm:$0xff] %vm1521_vm1, %v1409_v35 }
 0x1aa   :  { %v1053_v36 = vpop.f32.mrb[84].mxu0  ;;  %v1413_v37 = vpop.f32.mrb[84].mxu1 }
 0x1ab   :  { %1605 = vst [vmem:[%s3888_s3 + $0x2a0] sm:$0xff] %v1053_v36  ;;  %1725 = vst [vmem:[%s3888_s3 + $0x660] sm:$0xff] %v1413_v37  ;;  %v1055_v38 = vpop.f32.mrb[85].mxu0  ;;  %v1415_v39 = vpop.f32.mrb[85].mxu1 }
 0x1ac   :  { %1606 = vst.msk [vmem:[%s3888_s3 + $0x2a8] sm:$0xff] %vm1521_vm1, %v1055_v38  ;;  %1726 = vst.msk [vmem:[%s3888_s3 + $0x668] sm:$0xff] %vm1521_vm1, %v1415_v39 }
 0x1ae   :  { %v1059_v40 = vpop.f32.mrb[86].mxu0  ;;  %v1419_v41 = vpop.f32.mrb[86].mxu1 }
 0x1af   :  { %1607 = vst [vmem:[%s3888_s3 + $0x2b0] sm:$0xff] %v1059_v40  ;;  %1727 = vst [vmem:[%s3888_s3 + $0x670] sm:$0xff] %v1419_v41  ;;  %v1061_v42 = vpop.f32.mrb[87].mxu0  ;;  %v1421_v43 = vpop.f32.mrb[87].mxu1 }
 0x1b0   :  { %1608 = vst.msk [vmem:[%s3888_s3 + $0x2b8] sm:$0xff] %vm1521_vm1, %v1061_v42  ;;  %1728 = vst.msk [vmem:[%s3888_s3 + $0x678] sm:$0xff] %vm1521_vm1, %v1421_v43 }
 0x1b2   :  { %v1065_v44 = vpop.f32.mrb[88].mxu0  ;;  %v1425_v45 = vpop.f32.mrb[88].mxu1 }
 0x1b3   :  { %1609 = vst [vmem:[%s3888_s3 + $0x2c0] sm:$0xff] %v1065_v44  ;;  %1729 = vst [vmem:[%s3888_s3 + $0x680] sm:$0xff] %v1425_v45  ;;  %v1067_v46 = vpop.f32.mrb[89].mxu0  ;;  %v1427_v47 = vpop.f32.mrb[89].mxu1 }
 0x1b4   :  { %1610 = vst.msk [vmem:[%s3888_s3 + $0x2c8] sm:$0xff] %vm1521_vm1, %v1067_v46  ;;  %1730 = vst.msk [vmem:[%s3888_s3 + $0x688] sm:$0xff] %vm1521_vm1, %v1427_v47 }
 0x1b6   :  { %v1071_v48 = vpop.f32.mrb[90].mxu0  ;;  %v1431_v49 = vpop.f32.mrb[90].mxu1 }
 0x1b7   :  { %1611 = vst [vmem:[%s3888_s3 + $0x2d0] sm:$0xff] %v1071_v48  ;;  %1731 = vst [vmem:[%s3888_s3 + $0x690] sm:$0xff] %v1431_v49  ;;  %v1073_v50 = vpop.f32.mrb[91].mxu0  ;;  %v1433_v51 = vpop.f32.mrb[91].mxu1 }
 0x1b8   :  { %1612 = vst.msk [vmem:[%s3888_s3 + $0x2d8] sm:$0xff] %vm1521_vm1, %v1073_v50  ;;  %1732 = vst.msk [vmem:[%s3888_s3 + $0x698] sm:$0xff] %vm1521_vm1, %v1433_v51 }
 0x1ba   :  { %v1077_v52 = vpop.f32.mrb[92].mxu0  ;;  %v1437_v53 = vpop.f32.mrb[92].mxu1 }
 0x1bb   :  { %1613 = vst [vmem:[%s3888_s3 + $0x2e0] sm:$0xff] %v1077_v52  ;;  %1733 = vst [vmem:[%s3888_s3 + $0x6a0] sm:$0xff] %v1437_v53  ;;  %v1079_v54 = vpop.f32.mrb[93].mxu0  ;;  %v1439_v55 = vpop.f32.mrb[93].mxu1 }
 0x1bc   :  { %1614 = vst.msk [vmem:[%s3888_s3 + $0x2e8] sm:$0xff] %vm1521_vm1, %v1079_v54  ;;  %1734 = vst.msk [vmem:[%s3888_s3 + $0x6a8] sm:$0xff] %vm1521_vm1, %v1439_v55 }
 0x1be   :  { %v1083_v56 = vpop.f32.mrb[94].mxu0  ;;  %v1443_v57 = vpop.f32.mrb[94].mxu1 }
 0x1bf   :  { %1615 = vst [vmem:[%s3888_s3 + $0x2f0] sm:$0xff] %v1083_v56  ;;  %1735 = vst [vmem:[%s3888_s3 + $0x6b0] sm:$0xff] %v1443_v57  ;;  %v1085_v58 = vpop.f32.mrb[95].mxu0  ;;  %v1445_v59 = vpop.f32.mrb[95].mxu1 }
 0x1c0   :  { %1616 = vst.msk [vmem:[%s3888_s3 + $0x2f8] sm:$0xff] %vm1521_vm1, %v1085_v58  ;;  %1736 = vst.msk [vmem:[%s3888_s3 + $0x6b8] sm:$0xff] %vm1521_vm1, %v1445_v59 }
 0x1c2   :  { %v1089_v60 = vpop.f32.mrb[96].mxu0  ;;  %v1449_v61 = vpop.f32.mrb[96].mxu1 }
 0x1c3   :  { %1617 = vst [vmem:[%s3888_s3 + $0x300] sm:$0xff] %v1089_v60  ;;  %1737 = vst [vmem:[%s3888_s3 + $0x6c0] sm:$0xff] %v1449_v61  ;;  %v1091_v62 = vpop.f32.mrb[97].mxu0  ;;  %v1451_v63 = vpop.f32.mrb[97].mxu1 }
 0x1c4   :  { %1618 = vst.msk [vmem:[%s3888_s3 + $0x308] sm:$0xff] %vm1521_vm1, %v1091_v62  ;;  %1738 = vst.msk [vmem:[%s3888_s3 + $0x6c8] sm:$0xff] %vm1521_vm1, %v1451_v63 }
 0x1c6   :  { %v1095_v0 = vpop.f32.mrb[98].mxu0  ;;  %v1455_v1 = vpop.f32.mrb[98].mxu1 }
 0x1c7   :  { %1619 = vst [vmem:[%s3888_s3 + $0x310] sm:$0xff] %v1095_v0  ;;  %1739 = vst [vmem:[%s3888_s3 + $0x6d0] sm:$0xff] %v1455_v1  ;;  %v1097_v2 = vpop.f32.mrb[99].mxu0  ;;  %v1457_v3 = vpop.f32.mrb[99].mxu1 }
 0x1c8   :  { %1620 = vst.msk [vmem:[%s3888_s3 + $0x318] sm:$0xff] %vm1521_vm1, %v1097_v2  ;;  %1740 = vst.msk [vmem:[%s3888_s3 + $0x6d8] sm:$0xff] %vm1521_vm1, %v1457_v3 }
 0x1ca   :  { %v1101_v4 = vpop.f32.mrb[100].mxu0  ;;  %v1461_v5 = vpop.f32.mrb[100].mxu1 }
 0x1cb   :  { %1621 = vst [vmem:[%s3888_s3 + $0x320] sm:$0xff] %v1101_v4  ;;  %1741 = vst [vmem:[%s3888_s3 + $0x6e0] sm:$0xff] %v1461_v5  ;;  %v1103_v6 = vpop.f32.mrb[101].mxu0  ;;  %v1463_v7 = vpop.f32.mrb[101].mxu1 }
 0x1cc   :  { %1622 = vst.msk [vmem:[%s3888_s3 + $0x328] sm:$0xff] %vm1521_vm1, %v1103_v6  ;;  %1742 = vst.msk [vmem:[%s3888_s3 + $0x6e8] sm:$0xff] %vm1521_vm1, %v1463_v7 }
 0x1ce   :  { %v1107_v8 = vpop.f32.mrb[102].mxu0  ;;  %v1467_v9 = vpop.f32.mrb[102].mxu1 }
 0x1cf   :  { %1623 = vst [vmem:[%s3888_s3 + $0x330] sm:$0xff] %v1107_v8  ;;  %1743 = vst [vmem:[%s3888_s3 + $0x6f0] sm:$0xff] %v1467_v9  ;;  %v1109_v10 = vpop.f32.mrb[103].mxu0  ;;  %v1469_v11 = vpop.f32.mrb[103].mxu1 }
 0x1d0   :  { %1624 = vst.msk [vmem:[%s3888_s3 + $0x338] sm:$0xff] %vm1521_vm1, %v1109_v10  ;;  %1744 = vst.msk [vmem:[%s3888_s3 + $0x6f8] sm:$0xff] %vm1521_vm1, %v1469_v11 }
 0x1d2   :  { %v1113_v12 = vpop.f32.mrb[104].mxu0  ;;  %v1473_v13 = vpop.f32.mrb[104].mxu1 }
 0x1d3   :  { %1625 = vst [vmem:[%s3888_s3 + $0x340] sm:$0xff] %v1113_v12  ;;  %1745 = vst [vmem:[%s3888_s3 + $0x700] sm:$0xff] %v1473_v13  ;;  %v1115_v14 = vpop.f32.mrb[105].mxu0  ;;  %v1475_v15 = vpop.f32.mrb[105].mxu1 }
 0x1d4   :  { %1626 = vst.msk [vmem:[%s3888_s3 + $0x348] sm:$0xff] %vm1521_vm1, %v1115_v14  ;;  %1746 = vst.msk [vmem:[%s3888_s3 + $0x708] sm:$0xff] %vm1521_vm1, %v1475_v15 }
 0x1d6   :  { %v1119_v16 = vpop.f32.mrb[106].mxu0  ;;  %v1479_v17 = vpop.f32.mrb[106].mxu1 }
 0x1d7   :  { %1627 = vst [vmem:[%s3888_s3 + $0x350] sm:$0xff] %v1119_v16  ;;  %1747 = vst [vmem:[%s3888_s3 + $0x710] sm:$0xff] %v1479_v17  ;;  %v1121_v18 = vpop.f32.mrb[107].mxu0  ;;  %v1481_v19 = vpop.f32.mrb[107].mxu1 }
 0x1d8   :  { %1628 = vst.msk [vmem:[%s3888_s3 + $0x358] sm:$0xff] %vm1521_vm1, %v1121_v18  ;;  %1748 = vst.msk [vmem:[%s3888_s3 + $0x718] sm:$0xff] %vm1521_vm1, %v1481_v19 }
 0x1da   :  { %v1125_v20 = vpop.f32.mrb[108].mxu0  ;;  %v1485_v21 = vpop.f32.mrb[108].mxu1 }
 0x1db   :  { %1629 = vst [vmem:[%s3888_s3 + $0x360] sm:$0xff] %v1125_v20  ;;  %1749 = vst [vmem:[%s3888_s3 + $0x720] sm:$0xff] %v1485_v21  ;;  %v1127_v22 = vpop.f32.mrb[109].mxu0  ;;  %v1487_v23 = vpop.f32.mrb[109].mxu1 }
 0x1dc   :  { %1630 = vst.msk [vmem:[%s3888_s3 + $0x368] sm:$0xff] %vm1521_vm1, %v1127_v22  ;;  %1750 = vst.msk [vmem:[%s3888_s3 + $0x728] sm:$0xff] %vm1521_vm1, %v1487_v23 }
 0x1de   :  { %v1131_v24 = vpop.f32.mrb[110].mxu0  ;;  %v1491_v25 = vpop.f32.mrb[110].mxu1 }
 0x1df   :  { %1631 = vst [vmem:[%s3888_s3 + $0x370] sm:$0xff] %v1131_v24  ;;  %1751 = vst [vmem:[%s3888_s3 + $0x730] sm:$0xff] %v1491_v25  ;;  %v1133_v26 = vpop.f32.mrb[111].mxu0  ;;  %v1493_v27 = vpop.f32.mrb[111].mxu1 }
 0x1e0   :  { %1632 = vst.msk [vmem:[%s3888_s3 + $0x378] sm:$0xff] %vm1521_vm1, %v1133_v26  ;;  %1752 = vst.msk [vmem:[%s3888_s3 + $0x738] sm:$0xff] %vm1521_vm1, %v1493_v27 }
 0x1e2   :  { %v1137_v28 = vpop.f32.mrb[112].mxu0  ;;  %v1497_v29 = vpop.f32.mrb[112].mxu1 }
 0x1e3   :  { %1633 = vst [vmem:[%s3888_s3 + $0x380] sm:$0xff] %v1137_v28  ;;  %1753 = vst [vmem:[%s3888_s3 + $0x740] sm:$0xff] %v1497_v29  ;;  %v1139_v30 = vpop.f32.mrb[113].mxu0  ;;  %v1499_v31 = vpop.f32.mrb[113].mxu1 }
 0x1e4   :  { %1634 = vst.msk [vmem:[%s3888_s3 + $0x388] sm:$0xff] %vm1521_vm1, %v1139_v30  ;;  %1754 = vst.msk [vmem:[%s3888_s3 + $0x748] sm:$0xff] %vm1521_vm1, %v1499_v31 }
 0x1e6   :  { %v1143_v32 = vpop.f32.mrb[114].mxu0  ;;  %v1503_v33 = vpop.f32.mrb[114].mxu1 }
 0x1e7   :  { %1635 = vst [vmem:[%s3888_s3 + $0x390] sm:$0xff] %v1143_v32  ;;  %1755 = vst [vmem:[%s3888_s3 + $0x750] sm:$0xff] %v1503_v33  ;;  %v1145_v34 = vpop.f32.mrb[115].mxu0  ;;  %v1505_v35 = vpop.f32.mrb[115].mxu1 }
 0x1e8   :  { %1636 = vst.msk [vmem:[%s3888_s3 + $0x398] sm:$0xff] %vm1521_vm1, %v1145_v34  ;;  %1756 = vst.msk [vmem:[%s3888_s3 + $0x758] sm:$0xff] %vm1521_vm1, %v1505_v35 }
 0x1ea   :  { %v1149_v36 = vpop.f32.mrb[116].mxu0  ;;  %v1509_v37 = vpop.f32.mrb[116].mxu1 }
 0x1eb   :  { %1637 = vst [vmem:[%s3888_s3 + $0x3a0] sm:$0xff] %v1149_v36  ;;  %1757 = vst [vmem:[%s3888_s3 + $0x760] sm:$0xff] %v1509_v37  ;;  %v1151_v38 = vpop.f32.mrb[117].mxu0  ;;  %v1511_v39 = vpop.f32.mrb[117].mxu1 }
 0x1ec   :  { %1638 = vst.msk [vmem:[%s3888_s3 + $0x3a8] sm:$0xff] %vm1521_vm1, %v1151_v38  ;;  %1758 = vst.msk [vmem:[%s3888_s3 + $0x768] sm:$0xff] %vm1521_vm1, %v1511_v39 }
 0x1ee   :  { %v1155_v40 = vpop.f32.mrb[118].mxu0  ;;  %v1515_v41 = vpop.f32.mrb[118].mxu1 }
 0x1ef   :  { %1639 = vst [vmem:[%s3888_s3 + $0x3b0] sm:$0xff] %v1155_v40  ;;  %1759 = vst [vmem:[%s3888_s3 + $0x770] sm:$0xff] %v1515_v41  ;;  %v1157_v42 = vpop.f32.mrb[119].mxu0  ;;  %v1517_v43 = vpop.f32.mrb[119].mxu1 }
 0x1f0   :  { %1640 = vst.msk [vmem:[%s3888_s3 + $0x3b8] sm:$0xff] %vm1521_vm1, %v1157_v42  ;;  %1760 = vst.msk [vmem:[%s3888_s3 + $0x778] sm:$0xff] %vm1521_vm1, %v1517_v43 }

</bundles_post_ra>
